<compile_context>
chip_gen: v7x
topology: tpu7x:2x2x1
jax: 0.10.0
libtpu: 0.0.40
codegen_flags: <defaults>
</compile_context>

<pallas_src>
import functools
import math

import jax
import jax.numpy as jnp
from jax.experimental import pallas as pl
from jax.experimental.pallas import tpu as pltpu


# ----------------------------- Model config -----------------------------
class ModelArgs:
    dim = 64
    n_layers = 2
    n_heads = 4
    n_kv_heads = 2
    vocab_size = 256
    multiple_of = 32
    ffn_dim_multiplier = None
    norm_eps = 1e-5
    rope_theta = 500000.0
    max_seq_len = 16
    max_batch_size = 2


def ffn_hidden_dim(args: ModelArgs) -> int:
    hidden = 4 * args.dim
    hidden = int(2 * hidden / 3)
    if args.ffn_dim_multiplier is not None:
        hidden = int(args.ffn_dim_multiplier * hidden)
    return args.multiple_of * ((hidden + args.multiple_of - 1) // args.multiple_of)


# ----------------------------- Tiling helpers -----------------------------
# Explicit scoped-VMEM budget: v5e default is only 16 MiB (of 128), v6e/v7x default 32 MiB.
_VMEM_LIMIT_BYTES = 48 * 1024 * 1024

_ROW_TILES = (256, 128)        # MXU-height multiples for the M (row) axis
_LANE_TILES = (512, 256, 128)  # lane-dense tiles for N / ffn-hidden / kv-seq axes


def _cparams(dims):
    return pltpu.CompilerParams(dimension_semantics=dims,
                                vmem_limit_bytes=_VMEM_LIMIT_BYTES)


def _pick_tile(n, candidates):
    """Largest candidate tile dividing n; falls back to the full dimension (small toy shapes)."""
    for c in candidates:
        if n % c == 0:
            return c
    return n


# ----------------------------- Pallas kernels -----------------------------
def _norm_linear_kernel(x_ref, nw_ref, w_ref, o_ref, *, eps):
    """RMSNorm(x) @ W[:, tile]: norm stats f32, matmul bf16 with f32 accumulation."""
    x = x_ref[...].astype(jnp.float32)
    inv = jax.lax.rsqrt(jnp.mean(x * x, axis=-1, keepdims=True) + eps)
    xn = ((x * inv) * nw_ref[...]).astype(jnp.bfloat16)
    o_ref[...] = jnp.dot(xn, w_ref[...],
                         preferred_element_type=jnp.float32).astype(o_ref.dtype)


def norm_linear(x, norm_w, w_bf16, eps, out_dtype=jnp.float32):
    """x: (M, D) f32, norm_w: (D,), w_bf16: (D, N) bf16 -> (M, N). Grid-tiled over M and N."""
    # TODO(synk): for very large D also tile the K (reduction) axis with an f32 VMEM accumulator.
    M, D = x.shape
    N = w_bf16.shape[1]
    tm = _pick_tile(M, _ROW_TILES)
    tn = _pick_tile(N, _LANE_TILES)
    return pl.pallas_call(
        functools.partial(_norm_linear_kernel, eps=eps),
        out_shape=jax.ShapeDtypeStruct((M, N), out_dtype),
        grid=(M // tm, N // tn),
        in_specs=[
            pl.BlockSpec((tm, D), lambda i, j: (i, 0)),
            pl.BlockSpec((1, D), lambda i, j: (0, 0)),
            pl.BlockSpec((D, tn), lambda i, j: (0, j)),
        ],
        out_specs=pl.BlockSpec((tm, tn), lambda i, j: (i, j)),
        compiler_params=_cparams(("parallel", "parallel")),
    )(x, norm_w.reshape(1, D), w_bf16)


def _matmul_residual_kernel(x_ref, w_ref, res_ref, o_ref):
    """res + x @ W[:, tile]  (wo projection with the residual add fused in)."""
    o_ref[...] = res_ref[...] + jnp.dot(x_ref[...], w_ref[...],
                                        preferred_element_type=jnp.float32)


def matmul_residual(x_bf16, w_bf16, res_f32):
    M, K = x_bf16.shape
    N = w_bf16.shape[1]
    tm = _pick_tile(M, _ROW_TILES)
    tn = _pick_tile(N, _LANE_TILES)
    return pl.pallas_call(
        _matmul_residual_kernel,
        out_shape=jax.ShapeDtypeStruct((M, N), jnp.float32),
        grid=(M // tm, N // tn),
        in_specs=[
            pl.BlockSpec((tm, K), lambda i, j: (i, 0)),
            pl.BlockSpec((K, tn), lambda i, j: (0, j)),
            pl.BlockSpec((tm, tn), lambda i, j: (i, j)),
        ],
        out_specs=pl.BlockSpec((tm, tn), lambda i, j: (i, j)),
        compiler_params=_cparams(("parallel", "parallel")),
    )(x_bf16, w_bf16, res_f32)


def _norm_swiglu_kernel(x_ref, nw_ref, w1_ref, w3_ref, w2_ref, o_ref, acc_ref, *, eps):
    """x + (silu(xn@w1_tile) * (xn@w3_tile)) @ w2_tile, reduced over ffn tiles on the grid."""
    j = pl.program_id(1)

    @pl.when(j == 0)
    def _():
        acc_ref[...] = jnp.zeros_like(acc_ref)

    x = x_ref[...].astype(jnp.float32)
    inv = jax.lax.rsqrt(jnp.mean(x * x, axis=-1, keepdims=True) + eps)
    xn = ((x * inv) * nw_ref[...]).astype(jnp.bfloat16)
    g = jnp.dot(xn, w1_ref[...], preferred_element_type=jnp.float32)
    u = jnp.dot(xn, w3_ref[...], preferred_element_type=jnp.float32)
    mid = (g * jax.nn.sigmoid(g)) * u                       # SiLU gate in f32
    acc_ref[...] += jnp.dot(mid.astype(jnp.bfloat16), w2_ref[...],
                            preferred_element_type=jnp.float32)

    @pl.when(j == pl.num_programs(1) - 1)
    def _():
        o_ref[...] = x_ref[...] + acc_ref[...]              # fused residual add


def norm_swiglu(x, norm_w, w1_bf16, w3_bf16, w2_bf16, eps):
    """Fused RMSNorm + SwiGLU + w2 + residual.  Grid = (row tiles, ffn-hidden tiles)."""
    M, D = x.shape
    F = w1_bf16.shape[1]
    tm = _pick_tile(M, _ROW_TILES)
    tf = _pick_tile(F, _LANE_TILES)
    return pl.pallas_call(
        functools.partial(_norm_swiglu_kernel, eps=eps),
        out_shape=jax.ShapeDtypeStruct((M, D), jnp.float32),
        grid=(M // tm, F // tf),
        in_specs=[
            pl.BlockSpec((tm, D), lambda i, j: (i, 0)),
            pl.BlockSpec((1, D), lambda i, j: (0, 0)),
            pl.BlockSpec((D, tf), lambda i, j: (0, j)),
            pl.BlockSpec((D, tf), lambda i, j: (0, j)),
            pl.BlockSpec((tf, D), lambda i, j: (j, 0)),
        ],
        out_specs=pl.BlockSpec((tm, D), lambda i, j: (i, 0)),
        scratch_shapes=[pltpu.VMEM((tm, D), jnp.float32)],
        compiler_params=_cparams(("parallel", "arbitrary")),
    )(x, norm_w.reshape(1, D), w1_bf16, w3_bf16, w2_bf16)


def _flash_attn_kernel(sp_ref, q_ref, k_ref, v_ref, o_ref, m_sc, l_sc, acc_sc, *,
                       seq_len, scale, block_t):
    """Online-softmax attention for one (batch, kv-group) pair over one KV tile.
    q_ref: (n_rep*S, hd) — the n_rep GQA query heads sharing this kv head, stacked over rows."""
    t = pl.program_id(2)

    @pl.when(t == 0)
    def _():
        m_sc[...] = jnp.full_like(m_sc, -1e30)
        l_sc[...] = jnp.zeros_like(l_sc)
        acc_sc[...] = jnp.zeros_like(acc_sc)

    q = q_ref[...]                                      # (RS, hd) bf16
    k = k_ref[...]                                      # (tT, hd) bf16 (no transpose needed)
    s = jax.lax.dot_general(q, k, (((1,), (1,)), ((), ())),
                            preferred_element_type=jnp.float32) * scale   # (RS, tT)

    start_pos = sp_ref[0]
    rs, tt = s.shape
    row = jax.lax.broadcasted_iota(jnp.int32, (rs, tt), 0)
    qpos = (row % seq_len) + start_pos                  # query row r -> seq position r % S
    kpos = jax.lax.broadcasted_iota(jnp.int32, (rs, tt), 1) + t * block_t
    s = jnp.where(kpos <= qpos, s, -1e30)               # causal mask (also masks unwritten cache)

    m_prev = m_sc[...]
    m_new = jnp.maximum(m_prev, jnp.max(s, axis=-1, keepdims=True))
    alpha = jnp.exp(m_prev - m_new)
    p = jnp.exp(s - m_new)
    l_sc[...] = alpha * l_sc[...] + jnp.sum(p, axis=-1, keepdims=True)
    acc_sc[...] = alpha * acc_sc[...] + jnp.dot(p.astype(jnp.bfloat16), v_ref[...],
                                                preferred_element_type=jnp.float32)
    m_sc[...] = m_new

    @pl.when(t == pl.num_programs(2) - 1)
    def _():
        # approx reciprocal: EUP slot, ~2^-12 relative error — documented deviation.
        o_ref[...] = (acc_sc[...] * pl.reciprocal(l_sc[...], approx=True)).astype(o_ref.dtype)


def flash_attention(q, keys, values, start_pos, seq_len):
    """q: (B, G, n_rep*S, hd) bf16; keys/values: (B, G, maxT, hd) bf16 (full cache, masked).
    Returns (B, G, n_rep*S, hd) bf16."""
    B, G, RS, hd = q.shape
    maxT = keys.shape[2]
    tT = _pick_tile(maxT, _LANE_TILES)
    scale = 1.0 / math.sqrt(hd)
    sp = jnp.asarray(start_pos, jnp.int32).reshape(1)
    kernel = functools.partial(_flash_attn_kernel, seq_len=seq_len, scale=scale, block_t=tT)
    return pl.pallas_call(
        kernel,
        out_shape=jax.ShapeDtypeStruct((B, G, RS, hd), jnp.bfloat16),
        grid_spec=pltpu.PrefetchScalarGridSpec(
            num_scalar_prefetch=1,                      # start_pos lives in SMEM (jit-friendly)
            grid=(B, G, maxT // tT),
            in_specs=[
                pl.BlockSpec((None, None, RS, hd), lambda b, g, t, sp: (b, g, 0, 0)),
                pl.BlockSpec((None, None, tT, hd), lambda b, g, t, sp: (b, g, t, 0)),
                pl.BlockSpec((None, None, tT, hd), lambda b, g, t, sp: (b, g, t, 0)),
            ],
            out_specs=pl.BlockSpec((None, None, RS, hd), lambda b, g, t, sp: (b, g, 0, 0)),
            scratch_shapes=[
                pltpu.VMEM((RS, 1), jnp.float32),       # running max
                pltpu.VMEM((RS, 1), jnp.float32),       # running denominator
                pltpu.VMEM((RS, hd), jnp.float32),      # running numerator
            ],
        ),
        compiler_params=_cparams(("parallel", "parallel", "arbitrary")),
    )(sp, q, keys, values)


# ----------------------------- RoPE (JAX glue, f32 math on bf16 tensors) -----------------------------
def precompute_freqs(head_dim, seq_len, theta):
    inv = 1.0 / (theta ** (jnp.arange(0, head_dim, 2, dtype=jnp.float32) / head_dim))
    m = jnp.arange(seq_len, dtype=jnp.float32)
    freqs = jnp.outer(m, inv)                           # (seq_len, head_dim//2)
    return jnp.cos(freqs), jnp.sin(freqs)


def apply_rope(x, cos, sin):
    # x: (B, S, H, D). Pairs (x[..., 2i], x[..., 2i+1]) form the complex number,
    # matching torch.view_as_complex(x.reshape(..., -1, 2)).
    # TODO(synk): fuse RoPE into the QKV kernel via an even/odd lane swizzle (pltpu.roll).
    B, S, H, D = x.shape
    xr = x.astype(jnp.float32).reshape(B, S, H, D // 2, 2)
    x0, x1 = xr[..., 0], xr[..., 1]
    c = cos[None, :, None, :]
    s = sin[None, :, None, :]
    o0 = x0 * c - x1 * s
    o1 = x0 * s + x1 * c
    return jnp.stack([o0, o1], axis=-1).reshape(B, S, H, D).astype(x.dtype)


# ----------------------------- Parameters (weights stored bf16) -----------------------------
def init_params(args: ModelArgs, key):
    head_dim = args.dim // args.n_heads
    hidden = ffn_hidden_dim(args)
    qkv_out = (args.n_heads + 2 * args.n_kv_heads) * head_dim

    def dense(k, n_in, n_out):
        # stored already transposed (in, out) and in bf16 — no per-forward f32->bf16 HBM pass
        return (0.02 * jax.random.normal(k, (n_in, n_out), jnp.float32)).astype(jnp.bfloat16)

    keys = jax.random.split(key, 2 + 5 * args.n_layers)
    params = {
        "embed": 0.02 * jax.random.normal(keys[0], (args.vocab_size, args.dim), jnp.float32),
        "norm_w": jnp.ones((args.dim,), jnp.float32),
        "out_w": dense(keys[1], args.dim, args.vocab_size),
        "layers": [],
    }
    for i in range(args.n_layers):
        k = keys[2 + 5 * i: 2 + 5 * (i + 1)]
        params["layers"].append(
            {
                "attn_norm_w": jnp.ones((args.dim,), jnp.float32),
                "ffn_norm_w": jnp.ones((args.dim,), jnp.float32),
                "wqkv": dense(k[0], args.dim, qkv_out),               # [wq | wk | wv]
                "wo": dense(k[1], args.n_heads * head_dim, args.dim),
                "w1": dense(k[2], args.dim, hidden),
                "w3": dense(k[3], args.dim, hidden),
                "w2": dense(k[4], hidden, args.dim),
            }
        )
    return params


# ----------------------------- Forward pass (jit-able, traced start_pos) -----------------------------
def transformer_forward(args, params, tokens, start_pos, cache_k, cache_v, cos_all, sin_all):
    B, S = tokens.shape
    dim = args.dim
    n_heads = args.n_heads
    n_kv = args.n_kv_heads
    n_rep = n_heads // n_kv
    head_dim = dim // n_heads
    eps = args.norm_eps
    q_dim = n_heads * head_dim
    kv_dim = n_kv * head_dim

    h = jnp.take(params["embed"], tokens, axis=0)                     # (B, S, dim) f32 residual

    cos = jax.lax.dynamic_slice_in_dim(cos_all, start_pos, S, axis=0)
    sin = jax.lax.dynamic_slice_in_dim(sin_all, start_pos, S, axis=0)

    for li, lp in enumerate(params["layers"]):
        # --- fused RMSNorm + [wq|wk|wv] projection, bf16 output ---
        qkv = norm_linear(h.reshape(B * S, dim), lp["attn_norm_w"], lp["wqkv"], eps,
                          out_dtype=jnp.bfloat16)
        qkv = qkv.reshape(B, S, q_dim + 2 * kv_dim)
        q = qkv[..., :q_dim].reshape(B, S, n_heads, head_dim)
        k = qkv[..., q_dim:q_dim + kv_dim].reshape(B, S, n_kv, head_dim)
        v = qkv[..., q_dim + kv_dim:].reshape(B, S, n_kv, head_dim)

        q = apply_rope(q, cos, sin)
        k = apply_rope(k, cos, sin)

        # --- KV-cache update (layout: layers, B, n_kv, maxT, hd); donated under jit ---
        # TODO(synk): fold the cache update into a Pallas kernel with input_output_aliases.
        k_t = k.transpose(0, 2, 1, 3)
        v_t = v.transpose(0, 2, 1, 3)
        cache_k = cache_k.at[li].set(
            jax.lax.dynamic_update_slice(cache_k[li], k_t, (0, 0, start_pos, 0)))
        cache_v = cache_v.at[li].set(
            jax.lax.dynamic_update_slice(cache_v[li], v_t, (0, 0, start_pos, 0)))
        keys = cache_k[li, :B]                                        # (B, n_kv, maxT, hd) bf16
        values = cache_v[li, :B]

        # --- flash attention: GQA heads sharing a kv head stacked into one row block ---
        qg = q.transpose(0, 2, 1, 3).reshape(B, n_kv, n_rep * S, head_dim)
        attn = flash_attention(qg, keys, values, start_pos, S)        # (B, n_kv, n_rep*S, hd)
        attn = attn.reshape(B, n_kv, n_rep, S, head_dim).transpose(0, 3, 1, 2, 4)
        attn = attn.reshape(B * S, q_dim)

        # --- wo projection (K = all heads in one dot) + residual add, fused ---
        h = matmul_residual(attn, lp["wo"], h.reshape(B * S, dim)).reshape(B, S, dim)

        # --- fused RMSNorm + SwiGLU + w2 + residual ---
        h = norm_swiglu(h.reshape(B * S, dim), lp["ffn_norm_w"],
                        lp["w1"], lp["w3"], lp["w2"], eps).reshape(B, S, dim)

    # final fused RMSNorm + output head, vocab-tiled, bf16 logits writeback (cast to f32 outside)
    logits = norm_linear(h.reshape(B * S, dim), params["norm_w"], params["out_w"], eps,
                         out_dtype=jnp.bfloat16)
    return logits.reshape(B, S, args.vocab_size).astype(jnp.float32), cache_k, cache_v


# ----------------------------- Pure-JAX f32 reference -----------------------------
def reference_forward(args, params, tokens, start_pos):
    B, S = tokens.shape
    dim, n_heads, n_kv = args.dim, args.n_heads, args.n_kv_heads
    head_dim = dim // n_heads
    n_rep = n_heads // n_kv
    eps = args.norm_eps
    q_dim = n_heads * head_dim
    kv_dim = n_kv * head_dim

    def rn(x, w):
        return x * jax.lax.rsqrt(jnp.mean(x * x, -1, keepdims=True) + eps) * w

    h = jnp.take(params["embed"], tokens, axis=0)
    cos_all, sin_all = precompute_freqs(head_dim, args.max_seq_len * 2, args.rope_theta)
    cos, sin = cos_all[start_pos:start_pos + S], sin_all[start_pos:start_pos + S]

    for lp in params["layers"]:
        wqkv = lp["wqkv"].astype(jnp.float32)
        wq = wqkv[:, :q_dim]
        wk = wqkv[:, q_dim:q_dim + kv_dim]
        wv = wqkv[:, q_dim + kv_dim:]
        wo = lp["wo"].astype(jnp.float32)
        w1 = lp["w1"].astype(jnp.float32)
        w3 = lp["w3"].astype(jnp.float32)
        w2 = lp["w2"].astype(jnp.float32)

        xn = rn(h, lp["attn_norm_w"])
        q = (xn @ wq).reshape(B, S, n_heads, head_dim)
        k = (xn @ wk).reshape(B, S, n_kv, head_dim)
        v = (xn @ wv).reshape(B, S, n_kv, head_dim)
        q, k = apply_rope(q, cos, sin), apply_rope(k, cos, sin)
        k = jnp.repeat(k, n_rep, axis=2)
        v = jnp.repeat(v, n_rep, axis=2)
        qh, kh, vh = (t.transpose(0, 2, 1, 3) for t in (q, k, v))
        sc = jnp.einsum("bhqd,bhkd->bhqk", qh, kh) / math.sqrt(head_dim)
        i = jnp.arange(S)[:, None] + start_pos
        j = jnp.arange(S)[None, :]
        sc = jnp.where(j <= i, sc, -jnp.inf)
        p = jax.nn.softmax(sc, axis=-1)
        ao = jnp.einsum("bhqk,bhkd->bhqd", p, vh).transpose(0, 2, 1, 3).reshape(B, S, dim)
        h = h + ao @ wo
        xn2 = rn(h, lp["ffn_norm_w"])
        g = xn2 @ w1
        h = h + ((g * jax.nn.sigmoid(g)) * (xn2 @ w3)) @ w2
    return rn(h, params["norm_w"]) @ params["out_w"].astype(jnp.float32)


# ----------------------------- Main -----------------------------
if __name__ == "__main__":
    args = ModelArgs()
    head_dim = args.dim // args.n_heads

    key = jax.random.PRNGKey(0)
    pkey, tkey = jax.random.split(key)
    params = init_params(args, pkey)

    B, S = 2, 8
    start_pos = 0
    tokens = jax.random.randint(tkey, (B, S), 0, args.vocab_size, dtype=jnp.int32)

    # cache layout (layers, max_batch, n_kv, max_seq_len, head_dim): kv-seq is the tiled axis
    cache_k = jnp.zeros(
        (args.n_layers, args.max_batch_size, args.n_kv_heads, args.max_seq_len, head_dim),
        jnp.bfloat16,
    )
    cache_v = jnp.zeros_like(cache_k)

    cos_all, sin_all = precompute_freqs(head_dim, args.max_seq_len * 2, args.rope_theta)

    fwd = jax.jit(transformer_forward, static_argnums=(0,), donate_argnums=(4, 5))
    logits, cache_k, cache_v = fwd(args, params, tokens, jnp.int32(start_pos),
                                   cache_k, cache_v, cos_all, sin_all)
    logits = jax.block_until_ready(logits)

    assert logits.shape == (B, S, args.vocab_size)
    assert logits.dtype == jnp.float32
    assert bool(jnp.all(jnp.isfinite(logits)))

    ref = jax.block_until_ready(reference_forward(args, params, tokens, start_pos))
    max_err = float(jnp.max(jnp.abs(logits - ref)))
    # bf16 matmul / bf16 logits path vs f32 reference
    assert bool(jnp.allclose(logits, ref, rtol=2e-2, atol=1e-2)), (
        f"mismatch vs reference (max abs err {max_err})"
    )

    print("KERNEL_OK")
</pallas_src>

<mosaic_0001>
module attributes {stable_mosaic.version = 11 : i64} {
  func.func @_norm_linear_kernel(%arg0: i32, %arg1: i32, %arg2: memref<16x64xf32, #tpu.memory_space<vmem>>, %arg3: memref<1x64xf32, #tpu.memory_space<vmem>>, %arg4: memref<64x128xbf16, #tpu.memory_space<vmem>>, %arg5: memref<16x128xbf16, #tpu.memory_space<vmem>>) attributes {dimension_semantics = [#tpu.dimension_semantics<parallel>, #tpu.dimension_semantics<parallel>], iteration_bounds = array<i64: 1, 1>, scalar_prefetch = 0 : i64, scratch_operands = 0 : i64, tpu.core_type = #tpu.core_type<tc>, window_params = [{transform_indices = @transform_0, window_bounds = array<i64: 16, 64>}, {pipeline_mode = #tpu.pipeline_mode<synchronous>, transform_indices = @transform_1, window_bounds = array<i64: 1, 64>}, {transform_indices = @transform_2, window_bounds = array<i64: 64, 128>}, {transform_indices = @transform_3, window_bounds = array<i64: 16, 128>}]} {
    %c0 = arith.constant 0 : index
    %c0_0 = arith.constant 0 : index
    %0 = vector.load %arg2[%c0, %c0_0] : memref<16x64xf32, #tpu.memory_space<vmem>>, vector<16x64xf32>
    %1 = arith.mulf %0, %0 : vector<16x64xf32>
    %cst = arith.constant dense<0.000000e+00> : vector<16xf32>
    %2 = vector.multi_reduction <add>, %1, %cst [1] : vector<16x64xf32> to vector<16xf32>
    %3 = vector.shape_cast %2 : vector<16xf32> to vector<16x1xf32>
    %cst_1 = arith.constant 6.400000e+01 : f32
    %4 = vector.broadcast %cst_1 : f32 to vector<16x1xf32>
    %5 = arith.divf %3, %4 : vector<16x1xf32>
    %cst_2 = arith.constant 9.99999974E-6 : f32
    %6 = vector.broadcast %cst_2 : f32 to vector<16x1xf32>
    %7 = arith.addf %5, %6 : vector<16x1xf32>
    %8 = math.rsqrt %7 : vector<16x1xf32>
    %9 = vector.broadcast %8 : vector<16x1xf32> to vector<16x64xf32>
    %10 = arith.mulf %0, %9 : vector<16x64xf32>
    %c0_3 = arith.constant 0 : index
    %c0_4 = arith.constant 0 : index
    %11 = vector.load %arg3[%c0_3, %c0_4] : memref<1x64xf32, #tpu.memory_space<vmem>>, vector<1x64xf32>
    %12 = vector.broadcast %11 : vector<1x64xf32> to vector<16x64xf32>
    %13 = arith.mulf %10, %12 : vector<16x64xf32>
    %14 = arith.truncf %13 : vector<16x64xf32> to vector<16x64xbf16>
    %c0_5 = arith.constant 0 : index
    %c0_6 = arith.constant 0 : index
    %15 = vector.load %arg4[%c0_5, %c0_6] : memref<64x128xbf16, #tpu.memory_space<vmem>>, vector<64x128xbf16>
    %cst_7 = arith.constant dense<0.000000e+00> : vector<16x128xf32>
    %16 = tpu.matmul %14, %15, %cst_7 {dimension_numbers = #tpu.dot_dimension_numbers<[1], [0], [0], [1], [0, 0, 1, 1], [], []>} : vector<16x64xbf16>, vector<64x128xbf16>, vector<16x128xf32> -> vector<16x128xf32>
    %17 = arith.truncf %16 : vector<16x128xf32> to vector<16x128xbf16>
    %c0_8 = arith.constant 0 : index
    %c0_9 = arith.constant 0 : index
    %18 = vector.load %arg5[%c0_8, %c0_9] : memref<16x128xbf16, #tpu.memory_space<vmem>>, vector<16x128xbf16>
    tpu.vector_store %arg5[%c0_8, %c0_9], %17 {strides = array<i32>} : memref<16x128xbf16, #tpu.memory_space<vmem>>, vector<16x128xbf16>,
    return
  }
  func.func @transform_0(%arg0: i32, %arg1: i32) -> (i32, i32) {
    %c0_i32 = arith.constant 0 : i32
    %c0_i32_0 = arith.constant 0 : i32
    return %arg0, %c0_i32 : i32, i32
  }
  func.func @transform_1(%arg0: i32, %arg1: i32) -> (i32, i32) {
    %c0_i32 = arith.constant 0 : i32
    %c0_i32_0 = arith.constant 0 : i32
    %c0_i32_1 = arith.constant 0 : i32
    return %c0_i32, %c0_i32_0 : i32, i32
  }
  func.func @transform_2(%arg0: i32, %arg1: i32) -> (i32, i32) {
    %c0_i32 = arith.constant 0 : i32
    %c0_i32_0 = arith.constant 0 : i32
    return %c0_i32, %arg1 : i32, i32
  }
  func.func @transform_3(%arg0: i32, %arg1: i32) -> (i32, i32) {
    %c0_i32 = arith.constant 0 : i32
    return %arg0, %arg1 : i32, i32
  }
}

module attributes {stable_mosaic.version = 11 : i64} {
  func.func @_flash_attn_kernel(%arg0: i32, %arg1: i32, %arg2: i32, %arg3: memref<1xi32, #tpu.memory_space<smem>>, %arg4: memref<1x1x16x16xbf16, #tpu.memory_space<vmem>>, %arg5: memref<1x1x16x16xbf16, #tpu.memory_space<vmem>>, %arg6: memref<1x1x16x16xbf16, #tpu.memory_space<vmem>>, %arg7: memref<1x1x16x16xbf16, #tpu.memory_space<vmem>>, %arg8: memref<16x1xf32, #tpu.memory_space<vmem>>, %arg9: memref<16x1xf32, #tpu.memory_space<vmem>>, %arg10: memref<16x16xf32, #tpu.memory_space<vmem>>) attributes {dimension_semantics = [#tpu.dimension_semantics<parallel>, #tpu.dimension_semantics<parallel>, #tpu.dimension_semantics<arbitrary>], iteration_bounds = array<i64: 2, 2, 1>, scalar_prefetch = 1 : i64, scratch_operands = 3 : i64, tpu.core_type = #tpu.core_type<tc>, window_params = [{transform_indices = @transform_0, window_bounds = array<i64: 1, 1, 16, 16>}, {transform_indices = @transform_1, window_bounds = array<i64: 1, 1, 16, 16>}, {transform_indices = @transform_2, window_bounds = array<i64: 1, 1, 16, 16>}, {transform_indices = @transform_3, window_bounds = array<i64: 1, 1, 16, 16>}]} {
    %c0_i32 = arith.constant 0 : i32
    %0 = arith.cmpi eq, %arg2, %c0_i32 : i32
    %1 = arith.extui %0 : i1 to i32
    %c0_i32_0 = arith.constant 0 : i32
    %2 = arith.cmpi ne, %1, %c0_i32_0 : i32
    scf.if %2 {
      %cst_36 = arith.constant -1.000000e+30 : f32
      %65 = vector.broadcast %cst_36 : f32 to vector<16x1xf32>
      %c0_37 = arith.constant 0 : index
      %c0_38 = arith.constant 0 : index
      %66 = vector.load %arg8[%c0_37, %c0_38] : memref<16x1xf32, #tpu.memory_space<vmem>>, vector<16x1xf32>
      tpu.vector_store %arg8[%c0_37, %c0_38], %65 {strides = array<i32>} : memref<16x1xf32, #tpu.memory_space<vmem>>, vector<16x1xf32>,
      %cst_39 = arith.constant 0.000000e+00 : f32
      %67 = vector.broadcast %cst_39 : f32 to vector<16x1xf32>
      %c0_40 = arith.constant 0 : index
      %c0_41 = arith.constant 0 : index
      %68 = vector.load %arg9[%c0_40, %c0_41] : memref<16x1xf32, #tpu.memory_space<vmem>>, vector<16x1xf32>
      tpu.vector_store %arg9[%c0_40, %c0_41], %67 {strides = array<i32>} : memref<16x1xf32, #tpu.memory_space<vmem>>, vector<16x1xf32>,
      %cst_42 = arith.constant 0.000000e+00 : f32
      %69 = vector.broadcast %cst_42 : f32 to vector<16x16xf32>
      %c0_43 = arith.constant 0 : index
      %c0_44 = arith.constant 0 : index
      %70 = vector.load %arg10[%c0_43, %c0_44] : memref<16x16xf32, #tpu.memory_space<vmem>>, vector<16x16xf32>
      tpu.vector_store %arg10[%c0_43, %c0_44], %69 {strides = array<i32>} : memref<16x16xf32, #tpu.memory_space<vmem>>, vector<16x16xf32>,
    } else {
    }
    %c0 = arith.constant 0 : index
    %c0_1 = arith.constant 0 : index
    %c0_2 = arith.constant 0 : index
    %c0_3 = arith.constant 0 : index
    %3 = vector.load %arg4[%c0, %c0_1, %c0_2, %c0_3] : memref<1x1x16x16xbf16, #tpu.memory_space<vmem>>, vector<1x1x16x16xbf16>
    %4 = vector.shape_cast %3 : vector<1x1x16x16xbf16> to vector<16x16xbf16>
    %c0_4 = arith.constant 0 : index
    %c0_5 = arith.constant 0 : index
    %c0_6 = arith.constant 0 : index
    %c0_7 = arith.constant 0 : index
    %5 = vector.load %arg5[%c0_4, %c0_5, %c0_6, %c0_7] : memref<1x1x16x16xbf16, #tpu.memory_space<vmem>>, vector<1x1x16x16xbf16>
    %6 = vector.shape_cast %5 : vector<1x1x16x16xbf16> to vector<16x16xbf16>
    %cst = arith.constant dense<0.000000e+00> : vector<16x16xf32>
    %7 = tpu.matmul %4, %6, %cst {dimension_numbers = #tpu.dot_dimension_numbers<[1], [1], [0], [0], [0, 0, 1, 0], [], []>} : vector<16x16xbf16>, vector<16x16xbf16>, vector<16x16xf32> -> vector<16x16xf32>
    %cst_8 = arith.constant 2.500000e-01 : f32
    %8 = vector.broadcast %cst_8 : f32 to vector<16x16xf32>
    %9 = arith.mulf %7, %8 : vector<16x16xf32>
    %c0_9 = arith.constant 0 : index
    %10 = memref.load %arg3[%c0_9] : memref<1xi32, #tpu.memory_space<smem>>
    %11 = tpu.iota {dimensions = array<i32: 0>} : vector<16x16xi32>
    %c8_i32 = arith.constant 8 : i32
    %c0_i32_10 = arith.constant 0 : i32
    %12 = arith.cmpi eq, %c8_i32, %c0_i32_10 : i32
    %c1_i32 = arith.constant 1 : i32
    %13 = arith.select %12, %c1_i32, %c8_i32 : i32
    %14 = vector.broadcast %13 : i32 to vector<16x16xi32>
    %15 = arith.remsi %11, %14 : vector<16x16xi32>
    %c0_i32_11 = arith.constant 0 : i32
    %16 = vector.broadcast %c0_i32_11 : i32 to vector<16x16xi32>
    %17 = arith.cmpi ne, %15, %16 : vector<16x16xi32>
    %c0_i32_12 = arith.constant 0 : i32
    %18 = vector.broadcast %c0_i32_12 : i32 to vector<16x16xi32>
    %19 = arith.cmpi slt, %15, %18 : vector<16x16xi32>
    %c0_i32_13 = arith.constant 0 : i32
    %20 = arith.cmpi slt, %13, %c0_i32_13 : i32
    %21 = vector.broadcast %20 : i1 to vector<16x16xi1>
    %22 = vector.broadcast %21 : vector<16x16xi1> to vector<16x16xi1>
    %23 = arith.xori %19, %22 : vector<16x16xi1>
    %24 = arith.andi %23, %17 : vector<16x16xi1>
    %25 = vector.broadcast %13 : i32 to vector<16x16xi32>
    %26 = arith.addi %15, %25 : vector<16x16xi32>
    %27 = arith.select %24, %26, %15 : vector<16x16xi1>, vector<16x16xi32>
    %28 = vector.broadcast %10 : i32 to vector<16x16xi32>
    %29 = arith.addi %27, %28 : vector<16x16xi32>
    %30 = tpu.iota {dimensions = array<i32: 1>} : vector<16x16xi32>
    %c16_i32 = arith.constant 16 : i32
    %31 = arith.muli %arg2, %c16_i32 : i32
    %32 = vector.broadcast %31 : i32 to vector<16x16xi32>
    %33 = arith.addi %30, %32 : vector<16x16xi32>
    %34 = arith.cmpi sle, %33, %29 : vector<16x16xi32>
    %cst_14 = arith.constant -1.000000e+30 : f32
    %35 = vector.broadcast %cst_14 : f32 to vector<16x16xf32>
    %36 = arith.select %34, %9, %35 : vector<16x16xi1>, vector<16x16xf32>
    %c0_15 = arith.constant 0 : index
    %c0_16 = arith.constant 0 : index
    %37 = vector.load %arg8[%c0_15, %c0_16] : memref<16x1xf32, #tpu.memory_space<vmem>>, vector<16x1xf32>
    %cst_17 = arith.constant dense<0xFF800000> : vector<16xf32>
    %38 = vector.multi_reduction <maximumf>, %36, %cst_17 [1] : vector<16x16xf32> to vector<16xf32>
    %39 = vector.shape_cast %38 : vector<16xf32> to vector<16x1xf32>
    %40 = arith.maximumf %37, %39 : vector<16x1xf32>
    %41 = arith.subf %37, %40 : vector<16x1xf32>
    %42 = math.exp %41 : vector<16x1xf32>
    %43 = vector.broadcast %40 : vector<16x1xf32> to vector<16x16xf32>
    %44 = arith.subf %36, %43 : vector<16x16xf32>
    %45 = math.exp %44 : vector<16x16xf32>
    %c0_18 = arith.constant 0 : index
    %c0_19 = arith.constant 0 : index
    %46 = vector.load %arg9[%c0_18, %c0_19] : memref<16x1xf32, #tpu.memory_space<vmem>>, vector<16x1xf32>
    %47 = arith.mulf %42, %46 : vector<16x1xf32>
    %cst_20 = arith.constant dense<0.000000e+00> : vector<16xf32>
    %48 = vector.multi_reduction <add>, %45, %cst_20 [1] : vector<16x16xf32> to vector<16xf32>
    %49 = vector.shape_cast %48 : vector<16xf32> to vector<16x1xf32>
    %50 = arith.addf %47, %49 : vector<16x1xf32>
    %c0_21 = arith.constant 0 : index
    %c0_22 = arith.constant 0 : index
    %51 = vector.load %arg9[%c0_21, %c0_22] : memref<16x1xf32, #tpu.memory_space<vmem>>, vector<16x1xf32>
    tpu.vector_store %arg9[%c0_21, %c0_22], %50 {strides = array<i32>} : memref<16x1xf32, #tpu.memory_space<vmem>>, vector<16x1xf32>,
    %c0_23 = arith.constant 0 : index
    %c0_24 = arith.constant 0 : index
    %52 = vector.load %arg10[%c0_23, %c0_24] : memref<16x16xf32, #tpu.memory_space<vmem>>, vector<16x16xf32>
    %53 = vector.broadcast %42 : vector<16x1xf32> to vector<16x16xf32>
    %54 = arith.mulf %53, %52 : vector<16x16xf32>
    %55 = arith.truncf %45 : vector<16x16xf32> to vector<16x16xbf16>
    %c0_25 = arith.constant 0 : index
    %c0_26 = arith.constant 0 : index
    %c0_27 = arith.constant 0 : index
    %c0_28 = arith.constant 0 : index
    %56 = vector.load %arg6[%c0_25, %c0_26, %c0_27, %c0_28] : memref<1x1x16x16xbf16, #tpu.memory_space<vmem>>, vector<1x1x16x16xbf16>
    %57 = vector.shape_cast %56 : vector<1x1x16x16xbf16> to vector<16x16xbf16>
    %cst_29 = arith.constant dense<0.000000e+00> : vector<16x16xf32>
    %58 = tpu.matmul %55, %57, %cst_29 {dimension_numbers = #tpu.dot_dimension_numbers<[1], [0], [0], [1], [0, 0, 1, 1], [], []>} : vector<16x16xbf16>, vector<16x16xbf16>, vector<16x16xf32> -> vector<16x16xf32>
    %59 = arith.addf %54, %58 : vector<16x16xf32>
    %c0_30 = arith.constant 0 : index
    %c0_31 = arith.constant 0 : index
    %60 = vector.load %arg10[%c0_30, %c0_31] : memref<16x16xf32, #tpu.memory_space<vmem>>, vector<16x16xf32>
    tpu.vector_store %arg10[%c0_30, %c0_31], %59 {strides = array<i32>} : memref<16x16xf32, #tpu.memory_space<vmem>>, vector<16x16xf32>,
    %c0_32 = arith.constant 0 : index
    %c0_33 = arith.constant 0 : index
    %61 = vector.load %arg8[%c0_32, %c0_33] : memref<16x1xf32, #tpu.memory_space<vmem>>, vector<16x1xf32>
    tpu.vector_store %arg8[%c0_32, %c0_33], %40 {strides = array<i32>} : memref<16x1xf32, #tpu.memory_space<vmem>>, vector<16x1xf32>,
    %c0_i32_34 = arith.constant 0 : i32
    %62 = arith.cmpi eq, %arg2, %c0_i32_34 : i32
    %63 = arith.extui %62 : i1 to i32
    %c0_i32_35 = arith.constant 0 : i32
    %64 = arith.cmpi ne, %63, %c0_i32_35 : i32
    scf.if %64 {
      %c0_36 = arith.constant 0 : index
      %c0_37 = arith.constant 0 : index
      %65 = vector.load %arg10[%c0_36, %c0_37] : memref<16x16xf32, #tpu.memory_space<vmem>>, vector<16x16xf32>
      %c0_38 = arith.constant 0 : index
      %c0_39 = arith.constant 0 : index
      %66 = vector.load %arg9[%c0_38, %c0_39] : memref<16x1xf32, #tpu.memory_space<vmem>>, vector<16x1xf32>
      %67 = tpu.reciprocal %66 {approx = true} : vector<16x1xf32> -> vector<16x1xf32>
      %68 = vector.broadcast %67 : vector<16x1xf32> to vector<16x16xf32>
      %69 = arith.mulf %65, %68 : vector<16x16xf32>
      %70 = arith.truncf %69 : vector<16x16xf32> to vector<16x16xbf16>
      %c0_40 = arith.constant 0 : index
      %c0_41 = arith.constant 0 : index
      %c0_42 = arith.constant 0 : index
      %c0_43 = arith.constant 0 : index
      %71 = vector.load %arg7[%c0_40, %c0_41, %c0_42, %c0_43] : memref<1x1x16x16xbf16, #tpu.memory_space<vmem>>, vector<1x1x16x16xbf16>
      %72 = vector.shape_cast %71 : vector<1x1x16x16xbf16> to vector<16x16xbf16>
      %73 = vector.shape_cast %70 : vector<16x16xbf16> to vector<1x1x16x16xbf16>
      tpu.vector_store %arg7[%c0_40, %c0_41, %c0_42, %c0_43], %73 {strides = array<i32>} : memref<1x1x16x16xbf16, #tpu.memory_space<vmem>>, vector<1x1x16x16xbf16>,
    } else {
    }
    return
  }
  func.func @transform_0(%arg0: i32, %arg1: i32, %arg2: i32, %arg3: memref<1xi32, #tpu.memory_space<smem>>) -> (i32, i32, i32, i32) {
    %c0_i32 = arith.constant 0 : i32
    %c0_i32_0 = arith.constant 0 : i32
    %c0_i32_1 = arith.constant 0 : i32
    return %arg0, %arg1, %c0_i32, %c0_i32_0 : i32, i32, i32, i32
  }
  func.func @transform_1(%arg0: i32, %arg1: i32, %arg2: i32, %arg3: memref<1xi32, #tpu.memory_space<smem>>) -> (i32, i32, i32, i32) {
    %c0_i32 = arith.constant 0 : i32
    %c0_i32_0 = arith.constant 0 : i32
    return %arg0, %arg1, %arg2, %c0_i32 : i32, i32, i32, i32
  }
  func.func @transform_2(%arg0: i32, %arg1: i32, %arg2: i32, %arg3: memref<1xi32, #tpu.memory_space<smem>>) -> (i32, i32, i32, i32) {
    %c0_i32 = arith.constant 0 : i32
    %c0_i32_0 = arith.constant 0 : i32
    return %arg0, %arg1, %arg2, %c0_i32 : i32, i32, i32, i32
  }
  func.func @transform_3(%arg0: i32, %arg1: i32, %arg2: i32, %arg3: memref<1xi32, #tpu.memory_space<smem>>) -> (i32, i32, i32, i32) {
    %c0_i32 = arith.constant 0 : i32
    %c0_i32_0 = arith.constant 0 : i32
    %c0_i32_1 = arith.constant 0 : i32
    return %arg0, %arg1, %c0_i32, %c0_i32_0 : i32, i32, i32, i32
  }
}

module attributes {stable_mosaic.version = 11 : i64} {
  func.func @_matmul_residual_kernel(%arg0: i32, %arg1: i32, %arg2: memref<16x64xbf16, #tpu.memory_space<vmem>>, %arg3: memref<64x64xbf16, #tpu.memory_space<vmem>>, %arg4: memref<16x64xf32, #tpu.memory_space<vmem>>, %arg5: memref<16x64xf32, #tpu.memory_space<vmem>>) attributes {dimension_semantics = [#tpu.dimension_semantics<parallel>, #tpu.dimension_semantics<parallel>], iteration_bounds = array<i64: 1, 1>, scalar_prefetch = 0 : i64, scratch_operands = 0 : i64, tpu.core_type = #tpu.core_type<tc>, window_params = [{transform_indices = @transform_0, window_bounds = array<i64: 16, 64>}, {transform_indices = @transform_1, window_bounds = array<i64: 64, 64>}, {transform_indices = @transform_2, window_bounds = array<i64: 16, 64>}, {transform_indices = @transform_3, window_bounds = array<i64: 16, 64>}]} {
    %c0 = arith.constant 0 : index
    %c0_0 = arith.constant 0 : index
    %0 = vector.load %arg4[%c0, %c0_0] : memref<16x64xf32, #tpu.memory_space<vmem>>, vector<16x64xf32>
    %c0_1 = arith.constant 0 : index
    %c0_2 = arith.constant 0 : index
    %1 = vector.load %arg2[%c0_1, %c0_2] : memref<16x64xbf16, #tpu.memory_space<vmem>>, vector<16x64xbf16>
    %c0_3 = arith.constant 0 : index
    %c0_4 = arith.constant 0 : index
    %2 = vector.load %arg3[%c0_3, %c0_4] : memref<64x64xbf16, #tpu.memory_space<vmem>>, vector<64x64xbf16>
    %cst = arith.constant dense<0.000000e+00> : vector<16x64xf32>
    %3 = tpu.matmul %1, %2, %cst {dimension_numbers = #tpu.dot_dimension_numbers<[1], [0], [0], [1], [0, 0, 1, 1], [], []>} : vector<16x64xbf16>, vector<64x64xbf16>, vector<16x64xf32> -> vector<16x64xf32>
    %4 = arith.addf %0, %3 : vector<16x64xf32>
    %c0_5 = arith.constant 0 : index
    %c0_6 = arith.constant 0 : index
    %5 = vector.load %arg5[%c0_5, %c0_6] : memref<16x64xf32, #tpu.memory_space<vmem>>, vector<16x64xf32>
    tpu.vector_store %arg5[%c0_5, %c0_6], %4 {strides = array<i32>} : memref<16x64xf32, #tpu.memory_space<vmem>>, vector<16x64xf32>,
    return
  }
  func.func @transform_0(%arg0: i32, %arg1: i32) -> (i32, i32) {
    %c0_i32 = arith.constant 0 : i32
    %c0_i32_0 = arith.constant 0 : i32
    return %arg0, %c0_i32 : i32, i32
  }
  func.func @transform_1(%arg0: i32, %arg1: i32) -> (i32, i32) {
    %c0_i32 = arith.constant 0 : i32
    %c0_i32_0 = arith.constant 0 : i32
    return %c0_i32, %arg1 : i32, i32
  }
  func.func @transform_2(%arg0: i32, %arg1: i32) -> (i32, i32) {
    %c0_i32 = arith.constant 0 : i32
    return %arg0, %arg1 : i32, i32
  }
  func.func @transform_3(%arg0: i32, %arg1: i32) -> (i32, i32) {
    %c0_i32 = arith.constant 0 : i32
    return %arg0, %arg1 : i32, i32
  }
}

module attributes {stable_mosaic.version = 11 : i64} {
  func.func @_norm_swiglu_kernel(%arg0: i32, %arg1: i32, %arg2: memref<16x64xf32, #tpu.memory_space<vmem>>, %arg3: memref<1x64xf32, #tpu.memory_space<vmem>>, %arg4: memref<64x192xbf16, #tpu.memory_space<vmem>>, %arg5: memref<64x192xbf16, #tpu.memory_space<vmem>>, %arg6: memref<192x64xbf16, #tpu.memory_space<vmem>>, %arg7: memref<16x64xf32, #tpu.memory_space<vmem>>, %arg8: memref<16x64xf32, #tpu.memory_space<vmem>>) attributes {dimension_semantics = [#tpu.dimension_semantics<parallel>, #tpu.dimension_semantics<arbitrary>], iteration_bounds = array<i64: 1, 1>, scalar_prefetch = 0 : i64, scratch_operands = 1 : i64, tpu.core_type = #tpu.core_type<tc>, window_params = [{transform_indices = @transform_0, window_bounds = array<i64: 16, 64>}, {pipeline_mode = #tpu.pipeline_mode<synchronous>, transform_indices = @transform_1, window_bounds = array<i64: 1, 64>}, {transform_indices = @transform_2, window_bounds = array<i64: 64, 192>}, {transform_indices = @transform_3, window_bounds = array<i64: 64, 192>}, {transform_indices = @transform_4, window_bounds = array<i64: 192, 64>}, {transform_indices = @transform_5, window_bounds = array<i64: 16, 64>}]} {
    %c0_i32 = arith.constant 0 : i32
    %0 = arith.cmpi eq, %arg1, %c0_i32 : i32
    %1 = arith.extui %0 : i1 to i32
    %c0_i32_0 = arith.constant 0 : i32
    %2 = arith.cmpi ne, %1, %c0_i32_0 : i32
    scf.if %2 {
      %cst_22 = arith.constant 0.000000e+00 : f32
      %38 = vector.broadcast %cst_22 : f32 to vector<16x64xf32>
      %c0_23 = arith.constant 0 : index
      %c0_24 = arith.constant 0 : index
      %39 = vector.load %arg8[%c0_23, %c0_24] : memref<16x64xf32, #tpu.memory_space<vmem>>, vector<16x64xf32>
      tpu.vector_store %arg8[%c0_23, %c0_24], %38 {strides = array<i32>} : memref<16x64xf32, #tpu.memory_space<vmem>>, vector<16x64xf32>,
    } else {
    }
    %c0 = arith.constant 0 : index
    %c0_1 = arith.constant 0 : index
    %3 = vector.load %arg2[%c0, %c0_1] : memref<16x64xf32, #tpu.memory_space<vmem>>, vector<16x64xf32>
    %4 = arith.mulf %3, %3 : vector<16x64xf32>
    %cst = arith.constant dense<0.000000e+00> : vector<16xf32>
    %5 = vector.multi_reduction <add>, %4, %cst [1] : vector<16x64xf32> to vector<16xf32>
    %6 = vector.shape_cast %5 : vector<16xf32> to vector<16x1xf32>
    %cst_2 = arith.constant 6.400000e+01 : f32
    %7 = vector.broadcast %cst_2 : f32 to vector<16x1xf32>
    %8 = arith.divf %6, %7 : vector<16x1xf32>
    %cst_3 = arith.constant 9.99999974E-6 : f32
    %9 = vector.broadcast %cst_3 : f32 to vector<16x1xf32>
    %10 = arith.addf %8, %9 : vector<16x1xf32>
    %11 = math.rsqrt %10 : vector<16x1xf32>
    %12 = vector.broadcast %11 : vector<16x1xf32> to vector<16x64xf32>
    %13 = arith.mulf %3, %12 : vector<16x64xf32>
    %c0_4 = arith.constant 0 : index
    %c0_5 = arith.constant 0 : index
    %14 = vector.load %arg3[%c0_4, %c0_5] : memref<1x64xf32, #tpu.memory_space<vmem>>, vector<1x64xf32>
    %15 = vector.broadcast %14 : vector<1x64xf32> to vector<16x64xf32>
    %16 = arith.mulf %13, %15 : vector<16x64xf32>
    %17 = arith.truncf %16 : vector<16x64xf32> to vector<16x64xbf16>
    %c0_6 = arith.constant 0 : index
    %c0_7 = arith.constant 0 : index
    %18 = vector.load %arg4[%c0_6, %c0_7] : memref<64x192xbf16, #tpu.memory_space<vmem>>, vector<64x192xbf16>
    %cst_8 = arith.constant dense<0.000000e+00> : vector<16x192xf32>
    %19 = tpu.matmul %17, %18, %cst_8 {dimension_numbers = #tpu.dot_dimension_numbers<[1], [0], [0], [1], [0, 0, 1, 1], [], []>} : vector<16x64xbf16>, vector<64x192xbf16>, vector<16x192xf32> -> vector<16x192xf32>
    %c0_9 = arith.constant 0 : index
    %c0_10 = arith.constant 0 : index
    %20 = vector.load %arg5[%c0_9, %c0_10] : memref<64x192xbf16, #tpu.memory_space<vmem>>, vector<64x192xbf16>
    %cst_11 = arith.constant dense<0.000000e+00> : vector<16x192xf32>
    %21 = tpu.matmul %17, %20, %cst_11 {dimension_numbers = #tpu.dot_dimension_numbers<[1], [0], [0], [1], [0, 0, 1, 1], [], []>} : vector<16x64xbf16>, vector<64x192xbf16>, vector<16x192xf32> -> vector<16x192xf32>
    %22 = arith.negf %19 : vector<16x192xf32>
    %23 = math.exp %22 : vector<16x192xf32>
    %cst_12 = arith.constant 1.000000e+00 : f32
    %24 = vector.broadcast %cst_12 : f32 to vector<16x192xf32>
    %25 = arith.addf %24, %23 : vector<16x192xf32>
    %26 = arith.divf %24, %25 : vector<16x192xf32>
    %27 = arith.mulf %19, %26 : vector<16x192xf32>
    %28 = arith.mulf %27, %21 : vector<16x192xf32>
    %c0_13 = arith.constant 0 : index
    %c0_14 = arith.constant 0 : index
    %29 = vector.load %arg8[%c0_13, %c0_14] : memref<16x64xf32, #tpu.memory_space<vmem>>, vector<16x64xf32>
    %30 = arith.truncf %28 : vector<16x192xf32> to vector<16x192xbf16>
    %c0_15 = arith.constant 0 : index
    %c0_16 = arith.constant 0 : index
    %31 = vector.load %arg6[%c0_15, %c0_16] : memref<192x64xbf16, #tpu.memory_space<vmem>>, vector<192x64xbf16>
    %cst_17 = arith.constant dense<0.000000e+00> : vector<16x64xf32>
    %32 = tpu.matmul %30, %31, %cst_17 {dimension_numbers = #tpu.dot_dimension_numbers<[1], [0], [0], [1], [0, 0, 1, 1], [], []>} : vector<16x192xbf16>, vector<192x64xbf16>, vector<16x64xf32> -> vector<16x64xf32>
    %33 = arith.addf %29, %32 : vector<16x64xf32>
    %c0_18 = arith.constant 0 : index
    %c0_19 = arith.constant 0 : index
    %34 = vector.load %arg8[%c0_18, %c0_19] : memref<16x64xf32, #tpu.memory_space<vmem>>, vector<16x64xf32>
    tpu.vector_store %arg8[%c0_18, %c0_19], %33 {strides = array<i32>} : memref<16x64xf32, #tpu.memory_space<vmem>>, vector<16x64xf32>,
    %c0_i32_20 = arith.constant 0 : i32
    %35 = arith.cmpi eq, %arg1, %c0_i32_20 : i32
    %36 = arith.extui %35 : i1 to i32
    %c0_i32_21 = arith.constant 0 : i32
    %37 = arith.cmpi ne, %36, %c0_i32_21 : i32
    scf.if %37 {
      %c0_22 = arith.constant 0 : index
      %c0_23 = arith.constant 0 : index
      %38 = vector.load %arg2[%c0_22, %c0_23] : memref<16x64xf32, #tpu.memory_space<vmem>>, vector<16x64xf32>
      %c0_24 = arith.constant 0 : index
      %c0_25 = arith.constant 0 : index
      %39 = vector.load %arg8[%c0_24, %c0_25] : memref<16x64xf32, #tpu.memory_space<vmem>>, vector<16x64xf32>
      %40 = arith.addf %38, %39 : vector<16x64xf32>
      %c0_26 = arith.constant 0 : index
      %c0_27 = arith.constant 0 : index
      %41 = vector.load %arg7[%c0_26, %c0_27] : memref<16x64xf32, #tpu.memory_space<vmem>>, vector<16x64xf32>
      tpu.vector_store %arg7[%c0_26, %c0_27], %40 {strides = array<i32>} : memref<16x64xf32, #tpu.memory_space<vmem>>, vector<16x64xf32>,
    } else {
    }
    return
  }
  func.func @transform_0(%arg0: i32, %arg1: i32) -> (i32, i32) {
    %c0_i32 = arith.constant 0 : i32
    %c0_i32_0 = arith.constant 0 : i32
    return %arg0, %c0_i32 : i32, i32
  }
  func.func @transform_1(%arg0: i32, %arg1: i32) -> (i32, i32) {
    %c0_i32 = arith.constant 0 : i32
    %c0_i32_0 = arith.constant 0 : i32
    %c0_i32_1 = arith.constant 0 : i32
    return %c0_i32, %c0_i32_0 : i32, i32
  }
  func.func @transform_2(%arg0: i32, %arg1: i32) -> (i32, i32) {
    %c0_i32 = arith.constant 0 : i32
    %c0_i32_0 = arith.constant 0 : i32
    return %c0_i32, %arg1 : i32, i32
  }
  func.func @transform_3(%arg0: i32, %arg1: i32) -> (i32, i32) {
    %c0_i32 = arith.constant 0 : i32
    %c0_i32_0 = arith.constant 0 : i32
    return %c0_i32, %arg1 : i32, i32
  }
  func.func @transform_4(%arg0: i32, %arg1: i32) -> (i32, i32) {
    %c0_i32 = arith.constant 0 : i32
    %c0_i32_0 = arith.constant 0 : i32
    return %arg1, %c0_i32 : i32, i32
  }
  func.func @transform_5(%arg0: i32, %arg1: i32) -> (i32, i32) {
    %c0_i32 = arith.constant 0 : i32
    %c0_i32_0 = arith.constant 0 : i32
    return %arg0, %c0_i32 : i32, i32
  }
}

module attributes {stable_mosaic.version = 11 : i64} {
  func.func @_norm_linear_kernel(%arg0: i32, %arg1: i32, %arg2: memref<16x64xf32, #tpu.memory_space<vmem>>, %arg3: memref<1x64xf32, #tpu.memory_space<vmem>>, %arg4: memref<64x256xbf16, #tpu.memory_space<vmem>>, %arg5: memref<16x256xbf16, #tpu.memory_space<vmem>>) attributes {dimension_semantics = [#tpu.dimension_semantics<parallel>, #tpu.dimension_semantics<parallel>], iteration_bounds = array<i64: 1, 1>, scalar_prefetch = 0 : i64, scratch_operands = 0 : i64, tpu.core_type = #tpu.core_type<tc>, window_params = [{transform_indices = @transform_0, window_bounds = array<i64: 16, 64>}, {pipeline_mode = #tpu.pipeline_mode<synchronous>, transform_indices = @transform_1, window_bounds = array<i64: 1, 64>}, {transform_indices = @transform_2, window_bounds = array<i64: 64, 256>}, {transform_indices = @transform_3, window_bounds = array<i64: 16, 256>}]} {
    %c0 = arith.constant 0 : index
    %c0_0 = arith.constant 0 : index
    %0 = vector.load %arg2[%c0, %c0_0] : memref<16x64xf32, #tpu.memory_space<vmem>>, vector<16x64xf32>
    %1 = arith.mulf %0, %0 : vector<16x64xf32>
    %cst = arith.constant dense<0.000000e+00> : vector<16xf32>
    %2 = vector.multi_reduction <add>, %1, %cst [1] : vector<16x64xf32> to vector<16xf32>
    %3 = vector.shape_cast %2 : vector<16xf32> to vector<16x1xf32>
    %cst_1 = arith.constant 6.400000e+01 : f32
    %4 = vector.broadcast %cst_1 : f32 to vector<16x1xf32>
    %5 = arith.divf %3, %4 : vector<16x1xf32>
    %cst_2 = arith.constant 9.99999974E-6 : f32
    %6 = vector.broadcast %cst_2 : f32 to vector<16x1xf32>
    %7 = arith.addf %5, %6 : vector<16x1xf32>
    %8 = math.rsqrt %7 : vector<16x1xf32>
    %9 = vector.broadcast %8 : vector<16x1xf32> to vector<16x64xf32>
    %10 = arith.mulf %0, %9 : vector<16x64xf32>
    %c0_3 = arith.constant 0 : index
    %c0_4 = arith.constant 0 : index
    %11 = vector.load %arg3[%c0_3, %c0_4] : memref<1x64xf32, #tpu.memory_space<vmem>>, vector<1x64xf32>
    %12 = vector.broadcast %11 : vector<1x64xf32> to vector<16x64xf32>
    %13 = arith.mulf %10, %12 : vector<16x64xf32>
    %14 = arith.truncf %13 : vector<16x64xf32> to vector<16x64xbf16>
    %c0_5 = arith.constant 0 : index
    %c0_6 = arith.constant 0 : index
    %15 = vector.load %arg4[%c0_5, %c0_6] : memref<64x256xbf16, #tpu.memory_space<vmem>>, vector<64x256xbf16>
    %cst_7 = arith.constant dense<0.000000e+00> : vector<16x256xf32>
    %16 = tpu.matmul %14, %15, %cst_7 {dimension_numbers = #tpu.dot_dimension_numbers<[1], [0], [0], [1], [0, 0, 1, 1], [], []>} : vector<16x64xbf16>, vector<64x256xbf16>, vector<16x256xf32> -> vector<16x256xf32>
    %17 = arith.truncf %16 : vector<16x256xf32> to vector<16x256xbf16>
    %c0_8 = arith.constant 0 : index
    %c0_9 = arith.constant 0 : index
    %18 = vector.load %arg5[%c0_8, %c0_9] : memref<16x256xbf16, #tpu.memory_space<vmem>>, vector<16x256xbf16>
    tpu.vector_store %arg5[%c0_8, %c0_9], %17 {strides = array<i32>} : memref<16x256xbf16, #tpu.memory_space<vmem>>, vector<16x256xbf16>,
    return
  }
  func.func @transform_0(%arg0: i32, %arg1: i32) -> (i32, i32) {
    %c0_i32 = arith.constant 0 : i32
    %c0_i32_0 = arith.constant 0 : i32
    return %arg0, %c0_i32 : i32, i32
  }
  func.func @transform_1(%arg0: i32, %arg1: i32) -> (i32, i32) {
    %c0_i32 = arith.constant 0 : i32
    %c0_i32_0 = arith.constant 0 : i32
    %c0_i32_1 = arith.constant 0 : i32
    return %c0_i32, %c0_i32_0 : i32, i32
  }
  func.func @transform_2(%arg0: i32, %arg1: i32) -> (i32, i32) {
    %c0_i32 = arith.constant 0 : i32
    %c0_i32_0 = arith.constant 0 : i32
    return %c0_i32, %arg1 : i32, i32
  }
  func.func @transform_3(%arg0: i32, %arg1: i32) -> (i32, i32) {
    %c0_i32 = arith.constant 0 : i32
    return %arg0, %arg1 : i32, i32
  }
}

</mosaic_0001>

<bundles_post_ra>
// kernel: transformer_forward.9
= control target key start
LH: loop header
LB: loop body
LE: loop exit
PB: predicated region body
PF: predicated region fallthrough
CT: control target
= control target key end

     0   :  { %vm19_vm0 = vcmask 523264   ;;  %v177_v7 = vmov 0.0   ;;  %vm178_vm1 = vmmov 0   ;;  %s226_s0 = inlined_call_operand.vmem [shape: f32[16,64], index: 0, kind: input, shape index: {}]   ;;  %s227_s2 = inlined_call_operand.vmem [shape: bf16[64,128], index: 2, kind: input, shape index: {}]   ;;  %s228_s1 = inlined_call_operand.vmem [shape: f32[1,64], index: 1, kind: input, shape index: {}]   ;;  %s229_s3 = inlined_call_operand.vmem [shape: bf16[16,128], index: 3, kind: output, shape index: {}]  }
   0x1   :  { %v15_v0 = vld [vmem:[%s226_s0] sm:$0xff]  ;;  %v16_v1 = vld [vmem:[%s226_s0 + $0x8] sm:$0xff]  ;;  %155 = vmatprep.subr.bf16.mxu0 %v177_v7  ;;  %163 = vmatprep.mubr.msk.bf16.mxu0 %vm178_vm1, %v177_v7  ;;  %v171_v9 = vld [vmem:[%s227_s2 + $0x10] sm:$0xff]  }
   0x2   :  { %v17_v2 = vmul.f32 %v15_v0, %v15_v0  ;;  %v18_v3 = vmul.f32 %v16_v1, %v16_v1  ;;  %v169_v6 = vld [vmem:[%s227_s2] sm:$0xff]   ;;  %v170_v8 = vld [vmem:[%s227_s2 + $0x8] sm:$0xff]   ;;  %v172_v10 = vld [vmem:[%s227_s2 + $0x18] sm:$0xff]  }
   0x3   :  { %156 = vmatpush3.bf16.msra.mxu0 %v169_v6  ;;  %v135_v20 = vld [vmem:[%s228_s1] ss:$0 sm:$0xff] }
   0x4   :  { %v20_v4 = vsel %vm19_vm0, %v17_v2, 0.0  ;;  %v23_v5 = vsel %vm19_vm0, %v18_v3, 0.0  ;;  %157 = vmatprep.subr.bf16.mxu0 %v177_v7 }
   0x5   :  { %21 = vadd.xlane.f32.xlu0 %v20_v4 }
   0x7   :  { %158 = vmatpush3.bf16.msra.mxu0 %v170_v8 }
   0x8   :  { %159 = vmatprep.subr.bf16.mxu0 %v177_v7 }
   0x9   :  { %24 = vadd.xlane.f32.xlu0 %v23_v5 }
   0xb   :  { %160 = vmatpush3.bf16.msra.mxu0 %v171_v9 }
   0xc   :  { %161 = vmatprep.subr.bf16.mxu0 %v177_v7 }
   0xf   :  { %162 = vmatpush3.bf16.msra.mxu0 %v172_v10 }
  0x92   :  { %v22_v11 = vpop.xlane.xlu0 %21 }
  0x93   :  { %v27_v12 = vmul.f32 0.015625, %v22_v11 }
  0x95   :  { %v29_v13 = vadd.f32 1e-05, %v27_v12 }
  0x96   :  { %v25_v14 = vpop.xlane.xlu0 %24 }
  0x97   :  { %173 = vrsqrt.f32 %v29_v13  ;;  %v28_v15 = vmul.f32 0.015625, %v25_v14 }
  0x99   :  { %v30_v16 = vadd.f32 1e-05, %v28_v15 }
  0x9b   :  { %175 = vrsqrt.f32 %v30_v16 }
  0xa1   :  { %v174_v17 = vpop.eup %173 }
  0xa2   :  { %v33_v18 = vmul.f32 %v174_v17, %v15_v0 }
  0xa4   :  { %v42_v22 = vmul.f32 %v135_v20, %v33_v18 }
  0xa5   :  { %v176_v19 = vpop.eup %175 }
  0xa6   :  { %v34_v21 = vmul.f32 %v176_v19, %v16_v1 }
  0xa8   :  { %v43_v23 = vmul.f32 %v135_v20, %v34_v21 }
  0xaa   :  { %v44_v24 = vpack.c.bf16 %v43_v23, %v42_v22 }
  0xac   :  { %164 = vmatmul.mubr.msk.bf16.vlgmr.msra.gmra.mrb[0].mxu0 %vm19_vm0, %v44_v24 }
 0x17f   :  { %v114_v25 = vpop.f32.mrb[0].mxu0 }
 0x180   :  { %v165_v26 = vpop.f32.mrb[1].mxu0 }
 0x181   :  { %v117_v27 = vpop.f32.mrb[2].mxu0 }
 0x182   :  { %v148_v28 = vpack.c.bf16 %v117_v27, %v114_v25  ;;  %v166_v29 = vpop.f32.mrb[3].mxu0 }
 0x184   :  { %149 = vst [vmem:[%s229_s3] sm:$0xff] %v148_v28  }

// kernel: transformer_forward.11
= control target key start
LH: loop header
LB: loop body
LE: loop exit
PB: predicated region body
PF: predicated region fallthrough
CT: control target
= control target key end

     0   :  { %v139_v0 = vmov 0.0   ;;  %vm140_vm0 = vmmov 0   ;;  %vm56_vm1 = vcmask 523264   ;;  %s188_s1 = inlined_call_operand.vmem [shape: bf16[64,64], index: 1, kind: input, shape index: {}]   ;;  %s189_s0 = inlined_call_operand.vmem [shape: bf16[16,64], index: 0, kind: input, shape index: {}]   ;;  %s190_s2 = inlined_call_operand.vmem [shape: f32[16,64], index: 2, kind: input, shape index: {}]   ;;  %s191_s3 = inlined_call_operand.vmem [shape: f32[16,64], index: 3, kind: output, shape index: {}]  }
   0x1   :  { %120 = vmatprep.subr.bf16.mxu0 %v139_v0  ;;  %v134_v1 = vld [vmem:[%s188_s1] sm:$0xff]   ;;  %128 = vmatprep.mubr.msk.bf16.mxu0 %vm140_vm0, %v139_v0  ;;  %v135_v2 = vld [vmem:[%s188_s1 + $0x8] sm:$0xff]   ;;  %v136_v3 = vld [vmem:[%s188_s1 + $0x10] sm:$0xff]  }
   0x2   :  { %121 = vmatpush3.bf16.msra.mxu0 %v134_v1  ;;  %v137_v4 = vld [vmem:[%s188_s1 + $0x18] sm:$0xff]   ;;  %v138_v5 = vld [vmem:[%s189_s0] sm:$0xff]   ;;  %v16_v8 = vld [vmem:[%s190_s2 + $0x8] sm:$0xff] }
   0x3   :  { %122 = vmatprep.subr.bf16.mxu0 %v139_v0  ;;  %v15_v6 = vld [vmem:[%s190_s2] sm:$0xff] }
   0x6   :  { %123 = vmatpush3.bf16.msra.mxu0 %v135_v2 }
   0x7   :  { %124 = vmatprep.subr.bf16.mxu0 %v139_v0 }
   0xa   :  { %125 = vmatpush3.bf16.msra.mxu0 %v136_v3 }
   0xb   :  { %126 = vmatprep.subr.bf16.mxu0 %v139_v0 }
   0xe   :  { %127 = vmatpush3.bf16.msra.mxu0 %v137_v4 }
  0x11   :  { %129 = vmatmul.mubr.msk.bf16.vlgmr.msra.gmra.mrb[0].mxu0 %vm56_vm1, %v138_v5 }
  0xe4   :  { %v94_v7 = vpop.f32.mrb[0].mxu0 }
  0xe5   :  { %v101_v9 = vadd.f32 %v94_v7, %v15_v6  ;;  %v130_v10 = vpop.f32.mrb[1].mxu0 }
  0xe6   :  { %v97_v11 = vpop.f32.mrb[2].mxu0 }
  0xe7   :  { %103 = vst.msk [vmem:[%s191_s3] sm:$0xff] %vm56_vm1, %v101_v9  ;;  %v102_v12 = vadd.f32 %v97_v11, %v16_v8  ;;  %v131_v13 = vpop.f32.mrb[3].mxu0 }
  0xe9   :  { %104 = vst.msk [vmem:[%s191_s3 + $0x8] sm:$0xff] %vm56_vm1, %v102_v12 }

// kernel: transformer_forward.10
= control target key start
LH: loop header
LB: loop body
LE: loop exit
PB: predicated region body
PF: predicated region fallthrough
CT: control target
= control target key end

     0   :  { %s908_s17 = smov 0   ;;  %s910_s18 = smov 0   ;;  %s990_s0 = inlined_call_operand.<no memory space> [shape: s32[1], index: 0, kind: input, shape index: {}]   ;;  %s991_s1 = inlined_call_operand.vmem [shape: bf16[2,2,16,16], index: 1, kind: input, shape index: {}]   ;;  %s992_s2 = inlined_call_operand.vmem [shape: bf16[2,2,16,16], index: 2, kind: input, shape index: {}]   ;;  %s993_s3 = inlined_call_operand.vmem [shape: bf16[2,2,16,16], index: 3, kind: input, shape index: {}]   ;;  %s994_s4 = inlined_call_operand.vmem [shape: bf16[2,2,16,16], index: 4, kind: output, shape index: {}]  }
   0x1   :  { %9 = sst [smem:[#allocation6]] %s990_s0  ;;  %s912_s19 = smov 0  }
   0x2   :  { %s914_s20 = smov 0   ;;  %s916_s21 = smov 0  }
   0x3 LB: > { %s30_s0 = sadd.s32 1, %s866_s19  ;;  %s34_s22 = sadd.s32 1, %s870_s20  ;;  %s874_s21 = sphi %s916_s21, %s15_s21   ;;  %s870_s20 = sphi %s914_s20, %s998_s20   ;;  %s866_s19 = sphi %s912_s19, %s997_s19   ;;  %s862_s18 = sphi %s910_s18, %s996_s18   ;;  %s858_s17 = sphi %s908_s17, %s995_s17  }
   0x4   : > { %p32_p0 = scmp.ge.s32.totalorder %s30_s0, 2  ;;  %p735_p1 = scmp.ge.s32.totalorder %s874_s21, 1 }
   0x5   : > { %p212_p2 = scmp.lt.s32.totalorder %s874_s21, 5 }
   0x6   : > { %s1000_s0 = smov (%p32_p0, %s30_s0), 0  ;;  %s1002_s22 = smov (!%p32_p0, %s34_s22), %s870_s20 }
   0x7   : > { %p213_p3 = pnand %p735_p1, %p212_p2  ;;  %p36_p4 = scmp.ge.s32.totalorder %s1002_s22, 2 }
   0x8   : > { %p270_p5 = scmp.lt.s32.totalorder (!%p213_p3), %s862_s18, 1  ;;  %p272_p6 = scmp.lt.s32.totalorder (!%p213_p3), %s858_s17, 1  ;;  %vm326_vm0 = vcmask (!%p213_p3), 130048   ;;  %v876_v0 = vmov (!%p213_p3), 0.0   ;;  %vm877_vm1 = vmmov (!%p213_p3), 0   ;;  %vm321_vm2 = vcmask (!%p213_p3), 7168  }
   0x9   : > { %s1004_s22 = smov (%p36_p4, %s1002_s22), 0  ;;  %216 = sbr.rel (%p213_p3) target bundleno = 834 (0x342), region = 32 }
   0xa   : > { %763 = vmatprep.subr.bf16.mxu0 (!%p213_p3), %v876_v0  ;;  %327 = vst.msk [vmem:[#allocation4] sm:$0xff] (!%p213_p3), %vm326_vm0, %v876_v0  ;;  %328 = vst.msk [vmem:[#allocation4 + $0x8] sm:$0xff] (!%p213_p3), %vm326_vm0, %v876_v0  ;;  %765 = vmatprep.mubr.msk.bf16.mxu0 (!%p213_p3), %vm877_vm1, %v876_v0  ;;  %v878_v4 = vmov (!%p213_p3), -1e+30   ;;  %v394_v5 = vlaneseq (!%p213_p3)  ;;  %s393_s7 = sld [smem:[#allocation6]] (!%p213_p3)  ;;  %v879_v24 = vmov (!%p213_p3), 0  }
   0xb   : > { %769 = vmatprep.subr.bf16.mxu1 (!%p213_p3), %v876_v0  ;;  %771 = vmatprep.mubr.msk.bf16.mxu1 (!%p213_p3), %vm877_vm1, %v876_v0  ;;  %322 = vst.msk [vmem:[#allocation2] sm:$0xff] (!%p213_p3), %vm321_vm2, %v878_v4  ;;  %323 = vst.msk [vmem:[#allocation2 + $0x8] sm:$0xff] (!%p213_p3), %vm321_vm2, %v878_v4  ;;  %vm582_vm5 = vcmask (!%p213_p3), 125952  }
   0xc   : > { %324 = vst.msk [vmem:[#allocation3] sm:$0xff] (!%p213_p3), %vm321_vm2, %v876_v0  ;;  %325 = vst.msk [vmem:[#allocation3 + $0x8] sm:$0xff] (!%p213_p3), %vm321_vm2, %v876_v0  ;;  %v395_v6 = vshrl.u32 (!%p213_p3), %v394_v5, 7  ;;  %v425_v12 = vand.u32 (!%p213_p3), 127, %v394_v5  ;;  %819 = vset.pattern.permute.xlu1 (!%p213_p3), %v879_v24  ;;  %820 = vset.pattern.permute.xlu0 (!%p213_p3), %v879_v24 }
   0xe   : > { %v396_v7 = vadd.s32 (!%p213_p3), 8, %v395_v6  ;;  %v401_v8 = vand.u32 (!%p213_p3), 7, %v395_v6 }
  0x10   : > { %s1006_s18 = smov (!%p270_p5, %s862_s18), 1  ;;  %s1008_s17 = smov (!%p272_p6, %s858_s17), 1  ;;  %v421_v9 = vstv %s393_s7  ;;  %v408_v10 = vand.u32 7, %v396_v7 }
  0x11   : > { %s737_s23 = sshll.u32 %s1006_s18, 2  ;;  %s736_s24 = sshll.u32 %s1008_s17, 1  ;;  %v422_v11 = vadd.s32 %v421_v9, %v401_v8  ;;  %v480_v61 = vld [vmem:[#allocation4] sm:$0xff]  ;;  %v481_v63 = vld [vmem:[#allocation4 + $0x8] sm:$0xff] }
  0x12   : > { %s276_s25 = sadd.s32 %s737_s23, %s736_s24  ;;  %v423_v13 = vadd.s32 %v421_v9, %v408_v10  ;;  %v433_v25 = vld [vmem:[#allocation2] sm:$0xff]  ;;  %v434_v28 = vld [vmem:[#allocation2 + $0x8] sm:$0xff] }
  0x13   : > { %s940_s26 = sshll.u32 %s276_s25, 2  ;;  %vm429_vm3 = vcmp.le.s32.totalorder %v425_v12, %v422_v11  ;;  %v465_v49 = vld [vmem:[#allocation3] sm:$0xff]  ;;  %v466_v52 = vld [vmem:[#allocation3 + $0x8] sm:$0xff] }
  0x14   : > { %s291_s29 = scalar_lea.vmem %s992_s2, %s940_s26  ;;  %s278_s6 = scalar_lea.vmem %s991_s1, %s940_s26  ;;  %vm430_vm4 = vcmp.le.s32.totalorder %v425_v12, %v423_v13 }
  0x15   : > { %v821_v1 = vld [vmem:[%s291_s29] sm:$0xff]   ;;  %s305_s10 = scalar_lea.vmem %s993_s3, %s940_s26  ;;  %s315_s13 = scalar_lea.vmem %s994_s4, %s940_s26 }
  0x16   : > { %v348_v2 = vsel %vm326_vm0, %v821_v1, 0  ;;  %v822_v3 = vld [vmem:[%s278_s6] sm:$0xff]  }
  0x17   : > { %764 = vmatpush3.bf16.xpose.msra.mxu0 %v348_v2  ;;  %v823_v33 = vld [vmem:[%s305_s10] sm:$0xff]  }
  0x18   : > { %770 = vmatpush3.bf16.msra.mxu1 %v823_v33 }
  0x1e   : > { %766 = vmatmul.mubr.msk.bf16.vlgmr.msra.gmra.mrb[0].mxu0 %vm326_vm0, %v822_v3 }
  0xf1   : > { %v384_v14 = vpop.f32.mrb[0].mxu0 }
  0xf2   : > { %v391_v15 = vmul.f32 0.25, %v384_v14  ;;  %v767_v16 = vpop.f32.mrb[1].mxu0 }
  0xf3   : > { %v387_v17 = vpop.f32.mrb[2].mxu0 }
  0xf4   : > { %v392_v18 = vmul.f32 0.25, %v387_v17  ;;  %v768_v19 = vpop.f32.mrb[3].mxu0  ;;  %v431_v20 = vsel %vm429_vm3, %v391_v15, -1e+30 }
  0xf5   : > { %v435_v21 = vsel %vm326_vm0, %v431_v20, -inf }
  0xf6   : > { %436 = vmax.xlane.f32.xlu0 %v435_v21  ;;  %v432_v22 = vsel %vm430_vm4, %v392_v18, -1e+30 }
  0xf7   : > { %v438_v23 = vsel %vm326_vm0, %v432_v22, -inf }
  0xfa   : > { %439 = vmax.xlane.f32.xlu0 %v438_v23 }
 0x183   : > { %v437_v26 = vpop.xlane.xlu0 %436 }
 0x184   : > { %v441_v27 = vmax.f32 %v433_v25, %v437_v26 }
 0x186   : > { %v443_v29 = vsub.f32 %v433_v25, %v441_v27  ;;  %551 = vst.msk [vmem:[#allocation2] sm:$0xff] %vm321_vm2, %v441_v27  ;;  %451 = vperm.xlu1 %819, %v441_v27  }
 0x187   : > { %v440_v30 = vpop.xlane.xlu0 %439 }
 0x188   : > { %v442_v31 = vmax.f32 %v434_v28, %v440_v30  ;;  %v445_v46 = vmul.f32 1.442695, %v443_v29 }
 0x18a   : > { %v444_v32 = vsub.f32 %v434_v28, %v442_v31  ;;  %552 = vst.msk [vmem:[#allocation2 + $0x8] sm:$0xff] %vm321_vm2, %v442_v31  ;;  %456 = vperm.xlu1 %819, %v442_v31  }
 0x18c   : > { %v447_v45 = vmul.f32 1.442695, %v444_v32 }
 0x205   : > { %v452_v34 = vpop.permute.xlu1 %451 }
 0x206   : > { %v459_v35 = vsub.f32 %v431_v20, %v452_v34 }
 0x208   : > { %v461_v36 = vmul.f32 1.442695, %v459_v35 }
 0x209   : > { %v457_v37 = vpop.permute.xlu1 %456 }
 0x20a   : > { %824 = vpow2.f32 %v461_v36  ;;  %v460_v38 = vsub.f32 %v432_v22, %v457_v37 }
 0x20c   : > { %v463_v39 = vmul.f32 1.442695, %v460_v38 }
 0x20e   : > { %826 = vpow2.f32 %v463_v39 }
 0x20f   : > { %828 = vpow2.f32 %v447_v45 }
 0x210   : > { %830 = vpow2.f32 %v445_v46 }
 0x214   : > { %v825_v40 = vpop.eup %824 }
 0x215   : > { %v469_v41 = vsel %vm326_vm0, %v825_v40, 0.0 }
 0x216   : > { %470 = vadd.xlane.f32.xlu0 %v469_v41 }
 0x218   : > { %v827_v42 = vpop.eup %826 }
 0x219   : > { %v472_v43 = vsel %vm326_vm0, %v827_v42, 0.0  ;;  %v494_v44 = vpack.c.bf16 %v827_v42, %v825_v40  ;;  %v829_v47 = vpop.eup %828 }
 0x21a   : > { %473 = vadd.xlane.f32.xlu1 %v472_v43  ;;  %v831_v48 = vpop.eup %830  ;;  %v468_v54 = vmul.f32 %v829_v47, %v466_v52 }
 0x21b   : > { %772 = vmatmul.mubr.msk.bf16.vlgmr.msra.gmra.mrb[0].mxu1 %vm326_vm0, %v494_v44  ;;  %v467_v50 = vmul.f32 %v831_v48, %v465_v49 }
 0x22b   : > { %489 = vperm.xlu1 %819, %v829_v47  }
 0x22c   : > { %484 = vperm.xlu0 %820, %v831_v48  }
 0x2a3   : > { %v471_v51 = vpop.xlane.xlu0 %470 }
 0x2a4   : > { %v475_v53 = vadd.f32 %v471_v51, %v467_v50 }
 0x2a6   : > { %478 = vst.msk [vmem:[#allocation3] sm:$0xff] %vm321_vm2, %v475_v53 }
 0x2a7   : > { %v474_v55 = vpop.xlane.xlu1 %473 }
 0x2a8   : > { %v476_v56 = vadd.f32 %v474_v55, %v468_v54 }
 0x2aa   : > { %479 = vst.msk [vmem:[#allocation3 + $0x8] sm:$0xff] %vm321_vm2, %v476_v56 }
 0x2ab   : > { %v485_v62 = vpop.permute.xlu0 %484  ;;  %v490_v0 = vpop.permute.xlu1 %489 }
 0x2ac   : > { %v492_v1 = vmul.f32 %v485_v62, %v480_v61  ;;  %v493_v3 = vmul.f32 %v490_v0, %v481_v63 }
 0x2ad   : > { %v558_v57 = vld [vmem:[#allocation3] sm:$0xff] }
 0x2ae   : > { %832 = vrcp.f32 %v558_v57 }
 0x2b1   : > { %v559_v58 = vld [vmem:[#allocation3 + $0x8] sm:$0xff] }
 0x2b2   : > { %834 = vrcp.f32 %v559_v58 }
 0x2b8   : > { %v833_v59 = vpop.eup %832 }
 0x2b9   : > { %564 = vperm.xlu0 %820, %v833_v59  }
 0x2bc   : > { %v835_v60 = vpop.eup %834 }
 0x2bd   : > { %569 = vperm.xlu0 %820, %v835_v60  }
 0x2ee   : > { %v540_v2 = vpop.f32.mrb[0].mxu1 }
 0x2ef   : > { %v547_v4 = vadd.f32 %v540_v2, %v492_v1  ;;  %v773_v5 = vpop.f32.mrb[1].mxu1 }
 0x2f0   : > { %v543_v6 = vpop.f32.mrb[2].mxu1 }
 0x2f1   : > { %549 = vst.msk [vmem:[#allocation4] sm:$0xff] %vm326_vm0, %v547_v4  ;;  %v548_v7 = vadd.f32 %v543_v6, %v493_v3  ;;  %v774_v8 = vpop.f32.mrb[3].mxu1 }
 0x2f3   : > { %550 = vst.msk [vmem:[#allocation4 + $0x8] sm:$0xff] %vm326_vm0, %v548_v7 }
 0x2f8   : > { %v556_v9 = vld [vmem:[#allocation4] sm:$0xff] }
 0x2fa   : > { %v557_v13 = vld [vmem:[#allocation4 + $0x8] sm:$0xff] }
 0x338   : > { %v565_v10 = vpop.permute.xlu0 %564 }
 0x339   : > { %v572_v11 = vmul.f32 %v565_v10, %v556_v9 }
 0x33b   : > { %v757_v12 = vpack.c.bf16 %v572_v11, %v572_v11 }
 0x33c   : > { %v570_v14 = vpop.permute.xlu0 %569 }
 0x33d   : > { %583 = vst.msk [vmem:[%s315_s13] sm:$0xf] %vm582_vm5, %v757_v12  ;;  %v573_v15 = vmul.f32 %v570_v14, %v557_v13 }
 0x33f   : > { %v758_v16 = vpack.c.bf16 %v573_v15, %v573_v15 }
 0x341   : > { %584 = vst.msk [vmem:[%s315_s13 + $0x4] sm:$0xf] %vm582_vm5, %v758_v16 }
 0x342 PF: > { %s15_s21 = sadd.s32 1, %s874_s21   ;;  %s995_s17 = smov %s866_s19 }
 0x343   : > { %p12_p7 = scmp.ge.s32.totalorder %s15_s21, 6   ;;  %s996_s18 = smov %s870_s20 }
 0x344   : > { %s997_s19 = smov %s1000_s0  ;;  %s998_s20 = smov %s1004_s22 }
 0x345   :  { %14 = sbr.rel (!%p12_p7) target bundleno = 3 (0x3), region = 76 }

// kernel: transformer_forward.17
= control target key start
LH: loop header
LB: loop body
LE: loop exit
PB: predicated region body
PF: predicated region fallthrough
CT: control target
= control target key end

     0   :  { %vm19_vm0 = vcmask 523264   ;;  %v188_v9 = vmov 0   ;;  %s251_s0 = inlined_call_operand.vmem [shape: f32[16,64], index: 0, kind: input, shape index: {}]   ;;  %s252_s2 = inlined_call_operand.vmem [shape: bf16[64,256], index: 2, kind: input, shape index: {}]   ;;  %s253_s1 = inlined_call_operand.vmem [shape: f32[1,64], index: 1, kind: input, shape index: {}]   ;;  %s254_s3 = inlined_call_operand.vmem [shape: bf16[16,256], index: 3, kind: output, shape index: {}]  }
   0x1   :  { %v15_v0 = vld [vmem:[%s251_s0] sm:$0xff]  ;;  %v16_v1 = vld [vmem:[%s251_s0 + $0x8] sm:$0xff]  ;;  %v175_v8 = vld [vmem:[%s252_s2 + $0x14] ss:$8 sps:$4 sm:$0xff]   ;;  %128 = vmatprep.mubr.bf16.mxu0 %v188_v9 }
   0x2   :  { %v17_v2 = vmul.f32 %v15_v0, %v15_v0  ;;  %v18_v3 = vmul.f32 %v16_v1, %v16_v1  ;;  %v172_v6 = vld [vmem:[%s252_s2 + $0x4] ss:$8 sps:$4 sm:$0xff]   ;;  %v174_v7 = vld [vmem:[%s252_s2] ss:$8 sps:$4 sm:$0xff]   ;;  %v177_v10 = vld [vmem:[%s252_s2 + $0x10] ss:$8 sps:$4 sm:$0xff]  }
   0x3   :  { %96 = vmatprep.subr.bf16.mxu0 %v172_v6  ;;  %v178_v11 = vld [vmem:[%s252_s2 + $0x24] ss:$8 sps:$4 sm:$0xff]   ;;  %v180_v12 = vld [vmem:[%s252_s2 + $0x20] ss:$8 sps:$4 sm:$0xff]   ;;  %v181_v13 = vld [vmem:[%s252_s2 + $0x34] ss:$8 sps:$4 sm:$0xff]  }
   0x4   :  { %v20_v4 = vsel %vm19_vm0, %v17_v2, 0.0  ;;  %v23_v5 = vsel %vm19_vm0, %v18_v3, 0.0  ;;  %97 = vmatpush1.bf16.msra.mxu0 %v174_v7  ;;  %v183_v14 = vld [vmem:[%s252_s2 + $0x30] ss:$8 sps:$4 sm:$0xff]   ;;  %v157_v24 = vld [vmem:[%s253_s1] ss:$0 sm:$0xff] }
   0x5   :  { %21 = vadd.xlane.f32.xlu0 %v20_v4  ;;  %98 = vmatprep.subr.bf16.mxu0 %v175_v8 }
   0x8   :  { %99 = vmatpush1.bf16.msra.mxu0 %v177_v10 }
   0x9   :  { %24 = vadd.xlane.f32.xlu0 %v23_v5  ;;  %100 = vmatprep.subr.bf16.mxu0 %v178_v11 }
   0xc   :  { %101 = vmatpush1.bf16.msra.mxu0 %v180_v12 }
   0xd   :  { %102 = vmatprep.subr.bf16.mxu0 %v181_v13 }
  0x10   :  { %103 = vmatpush1.bf16.msra.mxu0 %v183_v14 }
  0x92   :  { %v22_v15 = vpop.xlane.xlu0 %21 }
  0x93   :  { %v27_v16 = vmul.f32 0.015625, %v22_v15 }
  0x95   :  { %v29_v17 = vadd.f32 1e-05, %v27_v16 }
  0x96   :  { %v25_v18 = vpop.xlane.xlu0 %24 }
  0x97   :  { %184 = vrsqrt.f32 %v29_v17  ;;  %v28_v19 = vmul.f32 0.015625, %v25_v18 }
  0x99   :  { %v30_v20 = vadd.f32 1e-05, %v28_v19 }
  0x9b   :  { %186 = vrsqrt.f32 %v30_v20 }
  0xa1   :  { %v185_v21 = vpop.eup %184 }
  0xa2   :  { %v33_v22 = vmul.f32 %v185_v21, %v15_v0 }
  0xa4   :  { %v42_v26 = vmul.f32 %v157_v24, %v33_v22 }
  0xa5   :  { %v187_v23 = vpop.eup %186 }
  0xa6   :  { %v34_v25 = vmul.f32 %v187_v23, %v16_v1 }
  0xa8   :  { %v43_v27 = vmul.f32 %v157_v24, %v34_v25 }
  0xaa   :  { %v44_v28 = vpack.c.bf16 %v43_v27, %v42_v26 }
  0xac   :  { %166 = vmatmul.mubr.msk.bf16.vlgmr.msra.gmra.mrb[0].mxu0 %vm19_vm0, %v44_v28 }
 0x17f   :  { %v130_v29 = vpop.f32.mrb[0].mxu0 }
 0x180   :  { %v132_v30 = vpop.f32.mrb[1].mxu0 }
 0x181   :  { %v169_v31 = vpack.c.bf16 %v132_v30, %v130_v29  ;;  %v134_v32 = vpop.f32.mrb[2].mxu0 }
 0x182   :  { %v136_v33 = vpop.f32.mrb[3].mxu0 }
 0x183   :  { %151 = vst [vmem:[%s254_s3] sm:$0xff] %v169_v31  ;;  %v170_v34 = vpack.c.bf16 %v136_v33, %v134_v32 }
 0x185   :  { %152 = vst [vmem:[%s254_s3 + $0x8] sm:$0xff] %v170_v34 }

// kernel: transformer_forward.12
= control target key start
LH: loop header
LB: loop body
LE: loop exit
PB: predicated region body
PF: predicated region fallthrough
CT: control target
= control target key end

     0   :  { %vm25_vm0 = vcmask 523264   ;;  %v532_v10 = vmov 0   ;;  %v533_v49 = vmov 0.0   ;;  %s700_s0 = inlined_call_operand.vmem [shape: f32[16,64], index: 0, kind: input, shape index: {}]   ;;  %s701_s2 = inlined_call_operand.vmem [shape: bf16[64,192], index: 2, kind: input, shape index: {}]   ;;  %s702_s3 = inlined_call_operand.vmem [shape: bf16[64,192], index: 3, kind: input, shape index: {}]   ;;  %s703_s4 = inlined_call_operand.vmem [shape: bf16[192,64], index: 4, kind: input, shape index: {}]   ;;  %s704_s1 = inlined_call_operand.vmem [shape: f32[1,64], index: 1, kind: input, shape index: {}]   ;;  %s705_s5 = inlined_call_operand.vmem [shape: f32[16,64], index: 5, kind: output, shape index: {}]  }
   0x1   :  { %v567_v0 = vld [vmem:[%s700_s0] sm:$0xff]  ;;  %v572_v1 = vld [vmem:[%s700_s0 + $0x8] sm:$0xff]  ;;  %v479_v8 = vld [vmem:[%s701_s2 + $0x14] ss:$8 sps:$4 sm:$0xff]   ;;  %141 = vmatprep.mubr.bf16.mxu1 %v532_v10  ;;  %378 = vmatprep.subr.bf16.mxu0 %v532_v10  ;;  %26 = vst.msk [vmem:[#allocation2] sm:$0xff] %vm25_vm0, %v533_v49 }
   0x2   :  { %v30_v2 = vmul.f32 %v567_v0, %v567_v0  ;;  %v31_v3 = vmul.f32 %v572_v1, %v572_v1  ;;  %v476_v6 = vld [vmem:[%s701_s2 + $0x4] ss:$8 sps:$4 sm:$0xff]   ;;  %v478_v7 = vld [vmem:[%s701_s2] ss:$8 sps:$4 sm:$0xff]   ;;  %v481_v9 = vld [vmem:[%s701_s2 + $0x10] ss:$8 sps:$4 sm:$0xff]  }
   0x3   :  { %109 = vmatprep.subr.bf16.mxu1 %v476_v6  ;;  %v482_v11 = vld [vmem:[%s701_s2 + $0x24] ss:$8 sps:$4 sm:$0xff]   ;;  %v484_v12 = vld [vmem:[%s701_s2 + $0x20] ss:$8 sps:$4 sm:$0xff]   ;;  %v485_v13 = vld [vmem:[%s701_s2 + $0x34] ss:$8 sps:$4 sm:$0xff]  }
   0x4   :  { %v33_v4 = vsel %vm25_vm0, %v30_v2, 0.0  ;;  %v36_v5 = vsel %vm25_vm0, %v31_v3, 0.0  ;;  %110 = vmatpush1.bf16.msra.mxu1 %v478_v7  ;;  %v487_v14 = vld [vmem:[%s701_s2 + $0x30] ss:$8 sps:$4 sm:$0xff]   ;;  %v490_v15 = vld [vmem:[%s702_s3 + $0x4] ss:$8 sps:$4 sm:$0xff]  }
   0x5   :  { %34 = vadd.xlane.f32.xlu0 %v33_v4  ;;  %111 = vmatprep.subr.bf16.mxu1 %v479_v8  ;;  %v500_v16 = vld [vmem:[%s703_s4] sm:$0xff]   ;;  %v501_v17 = vld [vmem:[%s703_s4 + $0x8] sm:$0xff]   ;;  %v502_v18 = vld [vmem:[%s703_s4 + $0x10] sm:$0xff]   ;;  %27 = vst.msk [vmem:[#allocation2 + $0x8] sm:$0xff] %vm25_vm0, %v533_v49 }
   0x6   :  { %379 = vmatpush1.bf16.msra.mxu0 %v500_v16  ;;  %v438_v28 = vld [vmem:[%s704_s1] ss:$0 sm:$0xff]  ;;  %v493_v34 = vld [vmem:[%s702_s3 + $0x14] ss:$8 sps:$4 sm:$0xff]   ;;  %v491_v35 = vld [vmem:[%s702_s3 + $0x10] ss:$8 sps:$4 sm:$0xff]  }
   0x7   :  { %380 = vmatprep.subr.bf16.mxu0 %v532_v10  ;;  %v488_v32 = vld [vmem:[%s702_s3] ss:$8 sps:$4 sm:$0xff]   ;;  %v496_v36 = vld [vmem:[%s702_s3 + $0x24] ss:$8 sps:$4 sm:$0xff]   ;;  %v499_v38 = vld [vmem:[%s702_s3 + $0x34] ss:$8 sps:$4 sm:$0xff]  }
   0x8   :  { %112 = vmatpush1.bf16.msra.mxu1 %v481_v9  ;;  %v494_v37 = vld [vmem:[%s702_s3 + $0x20] ss:$8 sps:$4 sm:$0xff]   ;;  %v497_v39 = vld [vmem:[%s702_s3 + $0x30] ss:$8 sps:$4 sm:$0xff]  }
   0x9   :  { %37 = vadd.xlane.f32.xlu0 %v36_v5  ;;  %113 = vmatprep.subr.bf16.mxu1 %v482_v11  ;;  %v503_v40 = vld [vmem:[%s703_s4 + $0x18] sm:$0xff]   ;;  %v504_v41 = vld [vmem:[%s703_s4 + $0x20] sm:$0xff]   ;;  %v505_v42 = vld [vmem:[%s703_s4 + $0x28] sm:$0xff]  }
   0xa   :  { %381 = vmatpush1.bf16.msra.mxu0 %v501_v17  ;;  %v506_v43 = vld [vmem:[%s703_s4 + $0x30] sm:$0xff]   ;;  %v507_v44 = vld [vmem:[%s703_s4 + $0x38] sm:$0xff]   ;;  %v508_v45 = vld [vmem:[%s703_s4 + $0x40] sm:$0xff]  }
   0xb   :  { %382 = vmatprep.subr.bf16.mxu0 %v532_v10  ;;  %v509_v46 = vld [vmem:[%s703_s4 + $0x48] sm:$0xff]   ;;  %v510_v47 = vld [vmem:[%s703_s4 + $0x50] sm:$0xff]   ;;  %v511_v48 = vld [vmem:[%s703_s4 + $0x58] sm:$0xff]  }
   0xc   :  { %114 = vmatpush1.bf16.msra.mxu1 %v484_v12 }
   0xd   :  { %115 = vmatprep.subr.bf16.mxu1 %v485_v13 }
   0xe   :  { %383 = vmatpush1.bf16.msra.mxu0 %v502_v18 }
   0xf   :  { %384 = vmatprep.subr.bf16.mxu0 %v532_v10 }
  0x10   :  { %116 = vmatpush1.bf16.msra.mxu1 %v487_v14 }
  0x11   :  { %200 = vmatprep.subr.bf16.mxu1 %v490_v15 }
  0x12   :  { %385 = vmatpush1.bf16.msra.mxu0 %v503_v40 }
  0x13   :  { %386 = vmatprep.subr.bf16.mxu0 %v532_v10 }
  0x16   :  { %387 = vmatpush1.bf16.msra.mxu0 %v504_v41 }
  0x17   :  { %388 = vmatprep.subr.bf16.mxu0 %v532_v10 }
  0x1a   :  { %389 = vmatpush1.bf16.msra.mxu0 %v505_v42 }
  0x1b   :  { %390 = vmatprep.subr.bf16.mxu0 %v532_v10 }
  0x1e   :  { %391 = vmatpush1.bf16.msra.mxu0 %v506_v43 }
  0x1f   :  { %392 = vmatprep.subr.bf16.mxu0 %v532_v10 }
  0x22   :  { %393 = vmatpush1.bf16.msra.mxu0 %v507_v44 }
  0x23   :  { %394 = vmatprep.subr.bf16.mxu0 %v532_v10 }
  0x26   :  { %395 = vmatpush1.bf16.msra.mxu0 %v508_v45 }
  0x27   :  { %396 = vmatprep.subr.bf16.mxu0 %v532_v10 }
  0x2a   :  { %397 = vmatpush1.bf16.msra.mxu0 %v509_v46 }
  0x2b   :  { %398 = vmatprep.subr.bf16.mxu0 %v532_v10 }
  0x2e   :  { %399 = vmatpush1.bf16.msra.mxu0 %v510_v47 }
  0x2f   :  { %400 = vmatprep.subr.bf16.mxu0 %v532_v10 }
  0x32   :  { %401 = vmatpush1.bf16.msra.mxu0 %v511_v48 }
  0x92   :  { %v35_v19 = vpop.xlane.xlu0 %34 }
  0x93   :  { %v40_v20 = vmul.f32 0.015625, %v35_v19 }
  0x95   :  { %v42_v21 = vadd.f32 1e-05, %v40_v20 }
  0x96   :  { %v38_v22 = vpop.xlane.xlu0 %37 }
  0x97   :  { %512 = vrsqrt.f32 %v42_v21  ;;  %v41_v23 = vmul.f32 0.015625, %v38_v22  ;;  %v275_v22 = vld [vmem:[#allocation2] sm:$0xff] }
  0x99   :  { %v43_v24 = vadd.f32 1e-05, %v41_v23 }
  0x9b   :  { %514 = vrsqrt.f32 %v43_v24  ;;  %v276_v24 = vld [vmem:[#allocation2 + $0x8] sm:$0xff] }
  0xa1   :  { %v513_v25 = vpop.eup %512 }
  0xa2   :  { %v46_v26 = vmul.f32 %v513_v25, %v567_v0 }
  0xa4   :  { %v55_v30 = vmul.f32 %v438_v28, %v46_v26 }
  0xa5   :  { %v515_v27 = vpop.eup %514 }
  0xa6   :  { %v47_v29 = vmul.f32 %v515_v27, %v572_v1 }
  0xa8   :  { %v56_v31 = vmul.f32 %v438_v28, %v47_v29 }
  0xaa   :  { %v57_v33 = vpack.c.bf16 %v56_v31, %v55_v30 }
  0xac   :  { %447 = vmatmul.mubr.msk.bf16.vlgmr.msra.gmra.mrb[0].mxu1 %vm25_vm0, %v57_v33 }
  0xad   :  { %201 = vmatpush1.bf16.msra.mxu1 %v488_v32  ;;  %232 = vmatprep.mubr.bf16.mxu1 %v532_v10 }
  0xae   :  { %202 = vmatprep.subr.bf16.mxu1 %v493_v34 }
  0xb1   :  { %203 = vmatpush1.bf16.msra.mxu1 %v491_v35 }
  0xb2   :  { %204 = vmatprep.subr.bf16.mxu1 %v496_v36 }
  0xb5   :  { %205 = vmatpush1.bf16.msra.mxu1 %v494_v37 }
  0xb6   :  { %206 = vmatprep.subr.bf16.mxu1 %v499_v38 }
  0xb9   :  { %207 = vmatpush1.bf16.msra.mxu1 %v497_v39 }
  0xbc   :  { %456 = vmatmul.mubr.msk.bf16.vlgmr.msra.gmra.mrb[4].mxu1 %vm25_vm0, %v57_v33 }
 0x17f   :  { %v143_v50 = vpop.f32.mrb[0].mxu1 }
 0x180   :  { %v457_v51 = vmul.f32 -1.442695, %v143_v50  ;;  %v145_v52 = vpop.f32.mrb[1].mxu1 }
 0x181   :  { %v458_v53 = vmul.f32 -1.442695, %v145_v52  ;;  %v147_v54 = vpop.f32.mrb[2].mxu1 }
 0x182   :  { %516 = vpow2.f32 %v457_v51  ;;  %v459_v55 = vmul.f32 -1.442695, %v147_v54  ;;  %v149_v56 = vpop.f32.mrb[3].mxu1 }
 0x183   :  { %518 = vpow2.f32 %v458_v53  ;;  %v460_v57 = vmul.f32 -1.442695, %v149_v56 }
 0x184   :  { %520 = vpow2.f32 %v459_v55 }
 0x185   :  { %522 = vpow2.f32 %v460_v57 }
 0x18c   :  { %v517_v58 = vpop.eup %516 }
 0x18d   :  { %v519_v59 = vpop.eup %518  ;;  %v255_v60 = vadd.f32 1.0, %v517_v58 }
 0x18e   :  { %v521_v61 = vpop.eup %520  ;;  %v256_v62 = vadd.f32 1.0, %v519_v59 }
 0x18f   :  { %v523_v63 = vpop.eup %522  ;;  %524 = vrcp.f32 %v255_v60  ;;  %v257_v2 = vadd.f32 1.0, %v521_v61  ;;  %v234_v3 = vpop.f32.mrb[4].mxu1 }
 0x190   :  { %526 = vrcp.f32 %v256_v62  ;;  %v258_v4 = vadd.f32 1.0, %v523_v63  ;;  %v236_v5 = vpop.f32.mrb[5].mxu1 }
 0x191   :  { %528 = vrcp.f32 %v257_v2  ;;  %v238_v6 = vpop.f32.mrb[6].mxu1 }
 0x192   :  { %530 = vrcp.f32 %v258_v4  ;;  %v240_v7 = vpop.f32.mrb[7].mxu1 }
 0x199   :  { %v525_v8 = vpop.eup %524 }
 0x19a   :  { %v527_v9 = vpop.eup %526  ;;  %v267_v10 = vmul.f32 %v525_v8, %v143_v50 }
 0x19b   :  { %v529_v11 = vpop.eup %528  ;;  %v268_v12 = vmul.f32 %v527_v9, %v145_v52 }
 0x19c   :  { %v531_v13 = vpop.eup %530  ;;  %v269_v14 = vmul.f32 %v529_v11, %v147_v54  ;;  %v271_v15 = vmul.f32 %v267_v10, %v234_v3 }
 0x19d   :  { %v270_v16 = vmul.f32 %v531_v13, %v149_v56  ;;  %v272_v17 = vmul.f32 %v268_v12, %v236_v5 }
 0x19e   :  { %v273_v18 = vmul.f32 %v269_v14, %v238_v6 }
 0x19f   :  { %v274_v19 = vmul.f32 %v270_v16, %v240_v7 }
 0x1a0   :  { %v277_v20 = vpack.c.bf16 %v273_v18, %v271_v15 }
 0x1a1   :  { %v278_v21 = vpack.c.bf16 %v274_v19, %v272_v17 }
 0x1a3   :  { %473 = vmatprep.mubr.msk.bf16.mxu0 %vm25_vm0, %v278_v21 }
 0x1a4   :  { %411 = vmatmul.mubr.bf16.vlgmr.msra.gmra.mrb[0].mxu0 %v277_v20 }
 0x277   :  { %v412_v23 = vpop.f32.mrb[0].mxu0 }
 0x278   :  { %v419_v25 = vadd.f32 %v412_v23, %v275_v22  ;;  %v414_v26 = vpop.f32.mrb[1].mxu0 }
 0x279   :  { %v415_v27 = vpop.f32.mrb[2].mxu0 }
 0x27a   :  { %421 = vst.msk [vmem:[#allocation2] sm:$0xff] %vm25_vm0, %v419_v25  ;;  %v420_v28 = vadd.f32 %v415_v27, %v276_v24  ;;  %v417_v29 = vpop.f32.mrb[3].mxu0 }
 0x27c   :  { %422 = vst.msk [vmem:[#allocation2 + $0x8] sm:$0xff] %vm25_vm0, %v420_v28 }
 0x281   :  { %v428_v30 = vld [vmem:[#allocation2] sm:$0xff] }
 0x282   :  { %v430_v31 = vadd.f32 %v428_v30, %v567_v0 }
 0x283   :  { %v429_v32 = vld [vmem:[#allocation2 + $0x8] sm:$0xff] }
 0x284   :  { %432 = vst.msk [vmem:[%s705_s5] sm:$0xff] %vm25_vm0, %v430_v31  ;;  %v431_v33 = vadd.f32 %v429_v32, %v572_v1 }
 0x286   :  { %433 = vst.msk [vmem:[%s705_s5 + $0x8] sm:$0xff] %vm25_vm0, %v431_v33 }

</bundles_post_ra>
